<compile_context>
chip_gen: v7x
topology: tpu7x:2x2x1
jax: 0.10.0
libtpu: 0.0.40
codegen_flags: <defaults>
</compile_context>

<pallas_src>
import itertools

import jax
import jax.numpy as jnp
from jax.experimental import pallas as pl
from jax.experimental.pallas import tpu as pltpu

# ----------------------------- configuration --------------------------------
INPUT_CHANNELS = 2
N_STAGES = 2
FEATURES_PER_STAGE = [32, 256]
MOD_FEATURES = [f // INPUT_CHANNELS for f in FEATURES_PER_STAGE]   # [16, 128]
KERNEL_SIZES = [3, 3]
STRIDES = [1, 2]
NUM_CLASSES = 3

TR_DIM, TR_HEADS, TR_DIM_HEAD, TR_MLP, TR_MAX_SEQ = 128, 4, 32, 256, 256
TR_INNER = TR_HEADS * TR_DIM_HEAD

K_TARGET = 128   # per-tap contraction-depth target (fills v5e MXU; fine on v6e/v7x)


def _derive_vmem_limit():
    """Generation-aware VMEM request: ~3/4 of physical (48 MiB v7x, 96 MiB v5e/v6e)."""
    try:
        cap = int(pltpu.get_tpu_info().vmem_capacity_bytes)
        return max(32 * 1024 * 1024, (cap * 3) // 4)
    except Exception:
        return 64 * 1024 * 1024


VMEM_LIMIT = _derive_vmem_limit()


def _round_up(x, m):
    return (x + m - 1) // m * m


def _cdiv(a, b):
    return (a + b - 1) // b


# ---------------------- K-tiled bf16 matmul (MXU) kernel ----------------------
def _mm_kernel(a_ref, b_ref, o_ref, acc_ref):
    @pl.when(pl.program_id(1) == 0)
    def _():
        acc_ref[...] = jnp.zeros_like(acc_ref)

    acc_ref[...] += jnp.dot(a_ref[...], b_ref[...],
                            preferred_element_type=jnp.float32)

    @pl.when(pl.program_id(1) == pl.num_programs(1) - 1)
    def _():
        o_ref[...] = acc_ref[...].astype(o_ref.dtype)


def pallas_matmul(a, b, out_dtype=jnp.float32):
    """(M,K) @ (K,N) -> (M,N): bf16 MXU inputs, f32 VMEM accumulator, K-tiled,
    exact (unpadded) N output, M tiled into >=2 parallel tiles when possible
    (uses both v7x TensorCores; negligible overhead on v5e/v6e)."""
    M, K = a.shape
    K2, N = b.shape
    assert K == K2
    if M >= 512:
        TM = 256
    elif M >= 256:
        TM = 128
    elif M >= 128:
        TM = 64
    else:
        TM = _round_up(M, 8)
    TK = 256 if K >= 512 else _round_up(K, 128)
    Mp, Kp = _round_up(M, TM), _round_up(K, TK)
    a_p = a.astype(jnp.bfloat16)
    b_p = b.astype(jnp.bfloat16)
    if (Mp, Kp) != (M, K):
        a_p = jnp.pad(a_p, ((0, Mp - M), (0, Kp - K)))
    if Kp != K:
        b_p = jnp.pad(b_p, ((0, Kp - K), (0, 0)))
    # TODO(synk): at production M, tile N as well / keep the B block resident so it
    # is not re-streamed from HBM for every M tile.
    out = pl.pallas_call(
        _mm_kernel,
        out_shape=jax.ShapeDtypeStruct((Mp, N), out_dtype),
        grid=(Mp // TM, Kp // TK),
        in_specs=[pl.BlockSpec((TM, TK), lambda i, k: (i, k)),
                  pl.BlockSpec((TK, N), lambda i, k: (k, 0))],
        out_specs=pl.BlockSpec((TM, N), lambda i, k: (i, 0)),
        scratch_shapes=[pltpu.VMEM((TM, N), jnp.float32)],
        compiler_params=pltpu.CompilerParams(
            dimension_semantics=("parallel", "arbitrary"),
            vmem_limit_bytes=VMEM_LIMIT),
    )(a_p, b_p)
    return out if Mp == M else out[:M]


# ----------------------- fused direct Conv3d Pallas kernel --------------------
def _make_conv_kernel(taps, tm, cout, fuse_head):
    """taps: tuple of (phase_index, flat_row_delta) for the remaining kernel taps.
    Each tap contracts over the folded K = k^fold * Cin axis on the MXU."""
    def _accumulate(x_ref, w_ref):
        r0 = pl.multiple_of(pl.program_id(1) * tm, tm)
        acc = jnp.zeros((tm, cout), jnp.float32)
        for t, (ph, delta) in enumerate(taps):
            a = x_ref[0, ph, pl.ds(r0 + delta, tm), :]          # (TM, Kf) bf16
            acc = acc + jnp.dot(a, w_ref[t], preferred_element_type=jnp.float32)
        return acc

    if fuse_head:
        def kernel(x_ref, w_ref, hw_ref, hb_ref, o_ref):
            acc = _accumulate(x_ref, w_ref)
            seg = jnp.dot(acc.astype(jnp.bfloat16), hw_ref[...],
                          preferred_element_type=jnp.float32) + hb_ref[...]
            o_ref[0] = seg.astype(o_ref.dtype)
    else:
        def kernel(x_ref, w_ref, o_ref):
            acc = _accumulate(x_ref, w_ref)
            o_ref[0] = acc.astype(o_ref.dtype)
    return kernel


def _choose_fold(cin, k, padded_vol_elems):
    """Fold trailing kernel dims into the contraction axis until K >= K_TARGET,
    capped so the wrapper-side partial im2col stays a small fraction of VMEM."""
    fold = 3
    for f in range(4):
        if cin * (k ** f) >= K_TARGET:
            fold = f
            break
    while fold > 0 and padded_vol_elems * cin * (k ** fold) * 2 > (VMEM_LIMIT // 4):
        fold -= 1
    return fold


def conv3d_cl(x, w, stride, padding, head_w=None, head_b=None):
    """PyTorch-semantics Conv3d (no bias), channel-last activations.

    x: (B, D, H, W, Cin)   w: (Cout, Cin, k, k, k)  ->  (B, Do, Ho, Wo, Cout) bf16.
    If head_w/head_b (1x1x1 seg head, (ncls, Cout, 1,1,1) / (ncls,)) are given, the
    head is fused into the epilogue and the output is (B, Do, Ho, Wo, ncls) f32.

    The wrapper zero-pads, folds the trailing kernel dims into the contraction
    axis (K = k^fold * Cin ~ 128) and phase-splits the remaining strided dims;
    the tap gather + matmul-accumulate is fused inside the Pallas kernel.
    """
    B, D, H, W, Cin = x.shape
    Cout, Cin2, k, _, _ = w.shape
    assert Cin == Cin2
    s, p = stride, padding
    Ld, Lh, Lw = D + 2 * p, H + 2 * p, W + 2 * p
    Do, Ho, Wo = (Ld - k) // s + 1, (Lh - k) // s + 1, (Lw - k) // s + 1

    fold = _choose_fold(Cin, k, Ld * Lh * Lw)
    rem = 3 - fold
    Kf = (k ** fold) * Cin
    n_phase = s ** rem

    # zero-pad; the remaining (un-folded) dims also pad up to a multiple of s
    L = [Ld, Lh, Lw]
    sizes = [D, H, W]
    E = [(_round_up(L[i], s) if i < rem else L[i]) for i in range(3)]
    xp = jnp.pad(x.astype(jnp.bfloat16),
                 ((0, 0),) + tuple((p, E[i] - sizes[i] - p) for i in range(3)) + ((0, 0),))

    # fold the trailing `fold` kernel dims into the channel (contraction) axis
    out_lens = (Do, Ho, Wo)
    xs = xp
    for i in range(fold):
        ax = 3 - i
        ol = out_lens[2 - i]
        parts = [jax.lax.slice_in_dim(xs, kk, kk + (ol - 1) * s + 1, stride=s, axis=ax)
                 for kk in range(k)]
        xs = jnp.stack(parts, axis=-2)
        xs = xs.reshape(xs.shape[:-2] + (xs.shape[-2] * xs.shape[-1],))

    # phase-split the remaining strided dims so tap windows are unit-stride rows
    if rem == 0:
        row_shape = (Do, Ho, Wo)
        xs = xs.reshape(B, 1, Do * Ho * Wo, Kf)
    else:
        row_shape = tuple(E[i] // s for i in range(rem)) + tuple(out_lens[i] for i in range(rem, 3))
        shape = (B,)
        for i in range(rem):
            shape += (E[i] // s, s)
        shape += xs.shape[1 + rem:]
        xs = xs.reshape(shape)
        perm = (0,) + tuple(2 + 2 * i for i in range(rem)) + tuple(1 + 2 * i for i in range(rem)) \
               + tuple(range(1 + 2 * rem, len(shape)))
        xs = jnp.transpose(xs, perm).reshape(B, n_phase, -1, Kf)

    # over-complete row space: outputs contaminated by row wrap are cropped later
    for j in range(rem):
        assert row_shape[j] >= out_lens[j] + (k - 1) // s

    row_strides = (row_shape[1] * row_shape[2], row_shape[2], 1)
    taps = []
    for kk in itertools.product(range(k), repeat=rem):
        phase, delta = 0, 0
        for j, kj in enumerate(kk):
            phase = phase * s + (kj % s)
            delta += (kj // s) * row_strides[j]
        taps.append((phase, delta))

    Pout = row_shape[0] * row_shape[1] * row_shape[2]
    acc_cap = max(8, (16384 // max(Cout, 1)) // 8 * 8)      # f32 acc <= 64 KiB (<=16 vregs)
    TM = min(512, acc_cap, _round_up(Pout, 8))
    n_tiles = _cdiv(Pout, TM)
    Mrows = n_tiles * TM
    maxdelta = max(d for _, d in taps)
    PX = _round_up(Mrows + maxdelta, 8)
    xs = jnp.pad(xs, ((0, 0), (0, 0), (0, PX - Pout), (0, 0)))

    wt = jnp.transpose(w, (2, 3, 4, 1, 0)).reshape(k ** rem, Kf, Cout).astype(jnp.bfloat16)

    fuse = head_w is not None
    if fuse:
        ncls = head_w.shape[0]
        hw = jnp.transpose(head_w.reshape(ncls, Cout), (1, 0)).astype(jnp.bfloat16)
        hb = head_b.reshape(1, ncls).astype(jnp.float32)
        out_ch, out_dtype = ncls, jnp.float32
    else:
        out_ch, out_dtype = Cout, jnp.bfloat16

    def _run(single_buffer):
        if single_buffer:
            x_spec = pl.BlockSpec((1, n_phase, PX, Kf), lambda b, i: (b, 0, 0, 0),
                                  pipeline_mode=pl.Buffered(1))
        else:
            x_spec = pl.BlockSpec((1, n_phase, PX, Kf), lambda b, i: (b, 0, 0, 0))
        in_specs = [x_spec,
                    pl.BlockSpec((k ** rem, Kf, Cout), lambda b, i: (0, 0, 0))]
        operands = [xs, wt]
        if fuse:
            in_specs += [pl.BlockSpec((Cout, out_ch), lambda b, i: (0, 0)),
                         pl.BlockSpec((1, out_ch), lambda b, i: (0, 0))]
            operands += [hw, hb]
        return pl.pallas_call(
            _make_conv_kernel(tuple(taps), TM, Cout, fuse),
            out_shape=jax.ShapeDtypeStruct((B, Mrows, out_ch), out_dtype),
            grid=(B, n_tiles),
            in_specs=in_specs,
            out_specs=pl.BlockSpec((1, TM, out_ch), lambda b, i: (b, i, 0)),
            compiler_params=pltpu.CompilerParams(
                dimension_semantics=("parallel", "parallel"),
                vmem_limit_bytes=VMEM_LIMIT),
        )(*operands)

    try:
        # the resident volume block is tile-invariant -> single-buffer it (halves VMEM)
        out = _run(True)
    except Exception:
        out = _run(False)

    out = out[:, :Pout].reshape((B,) + row_shape + (out_ch,))[:, :Do, :Ho, :Wo, :]
    return out


def conv_transpose3d_cl(x, w, stride):
    """ConvTranspose3d with kernel==stride, no bias, channel-last.
    x: (B, D, H, W, Cin)   w: (Cin, Cout, s, s, s)."""
    B, D, H, W, Cin = x.shape
    Cin2, Cout, s, _, _ = w.shape
    assert Cin == Cin2 and s == stride
    xm = x.reshape(B * D * H * W, Cin)
    # columns ordered (sd, sh, sw, Cout) so channels stay the minor (lane) axis below
    wm = jnp.transpose(w, (0, 2, 3, 4, 1)).reshape(Cin, s ** 3 * Cout)
    out = pallas_matmul(xm, wm, out_dtype=jnp.bfloat16)
    out = out.reshape(B, D, H, W, s, s, s, Cout)
    # TODO(synk): this output re-interleave could be fused into the following decoder
    # conv by consuming the phase-major layout directly; kept as one XLA transpose
    # (channels stay minor -> contiguous lane-block copies).
    out = jnp.transpose(out, (0, 1, 4, 2, 5, 3, 6, 7))
    return out.reshape(B, D * s, H * s, W * s, Cout)


# ------------------------ fused Transformer Pallas kernel ---------------------
def _layernorm(x, g, b, eps=1e-5):
    mu = jnp.mean(x, axis=-1, keepdims=True)
    var = jnp.mean((x - mu) ** 2, axis=-1, keepdims=True)
    return (x - mu) * jax.lax.rsqrt(var + eps) * g + b


def _transformer_kernel(x_ref, pos_ref, g1_ref, b1_ref, wqkv_ref, wo_ref, bo_ref,
                        g2_ref, b2_ref, w1_ref, bb1_ref, w2_ref, bb2_ref,
                        gf_ref, bf_ref, o_ref):
    N = x_ref.shape[1]
    Hh, dh, inner = TR_HEADS, TR_DIM_HEAD, TR_INNER
    scale = dh ** -0.5

    # residual stream / statistics in f32; matmul inputs cast to bf16 (MXU-native)
    x = x_ref[0].astype(jnp.float32) + pos_ref[...].astype(jnp.float32)     # (N, D)

    # ----- Attention block (pre-norm, residual) -----
    h = _layernorm(x, g1_ref[...], b1_ref[...])
    qkv = jnp.dot(h.astype(jnp.bfloat16), wqkv_ref[...],
                  preferred_element_type=jnp.float32)                       # (N, 3*inner)

    def split_heads(block):                                                 # -> (H, N, dh)
        return jnp.stack([block[:, hh * dh:(hh + 1) * dh] for hh in range(Hh)],
                         axis=0).astype(jnp.bfloat16)

    q = split_heads(qkv[:, :inner])
    kk = split_heads(qkv[:, inner:2 * inner])
    v = split_heads(qkv[:, 2 * inner:])
    dots = jnp.einsum('hnd,hmd->hnm', q, kk,
                      preferred_element_type=jnp.float32) * scale           # (H, N, N)
    dots = dots - jnp.max(dots, axis=-1, keepdims=True)
    e = jnp.exp(dots)
    attn = e * pl.reciprocal(jnp.sum(e, axis=-1, keepdims=True), approx=True)
    ov = jnp.einsum('hnm,hmd->hnd', attn.astype(jnp.bfloat16), v,
                    preferred_element_type=jnp.float32)                     # (H, N, dh)
    # lane-concat the head outputs -> ONE K=128 output projection
    cat = jnp.concatenate([ov[hh] for hh in range(Hh)], axis=-1)            # (N, inner)
    x = x + jnp.dot(cat.astype(jnp.bfloat16), wo_ref[...],
                    preferred_element_type=jnp.float32) + bo_ref[...]

    # ----- FeedForward block (pre-norm, residual) -----
    h = _layernorm(x, g2_ref[...], b2_ref[...])
    h = jnp.dot(h.astype(jnp.bfloat16), w1_ref[...],
                preferred_element_type=jnp.float32) + bb1_ref[...]
    h = jax.nn.gelu(h, approximate=True)          # tanh GELU (EUP); approximates nn.GELU
    h = jnp.dot(h.astype(jnp.bfloat16), w2_ref[...],
                preferred_element_type=jnp.float32) + bb2_ref[...]
    x = x + h

    o_ref[0] = _layernorm(x, gf_ref[...], bf_ref[...])


def transformer_forward(tok, tp):
    """tok: (B, N, 128) f32 -> (B, N, 128) f32.  One fused kernel, grid over B
    (parallel -> both v7x TensorCores; negligible loop overhead on v5e/v6e)."""
    B, N, Dm = tok.shape
    assert Dm == TR_DIM and N <= TR_MAX_SEQ and N % 8 == 0
    f32 = lambda a: a.astype(jnp.float32)
    b16 = lambda a: a.astype(jnp.bfloat16)
    weights = [f32(tp['pos'][:N]),
               f32(tp['ln1_g']), f32(tp['ln1_b']),
               b16(tp['w_qkv']), b16(tp['w_out']), f32(tp['b_out']),
               f32(tp['ln2_g']), f32(tp['ln2_b']),
               b16(tp['w1']), f32(tp['b1']), b16(tp['w2']), f32(tp['b2']),
               f32(tp['lnf_g']), f32(tp['lnf_b'])]
    in_specs = [pl.BlockSpec((1, N, Dm), lambda b: (b, 0, 0))]
    for wgt in weights:
        in_specs.append(pl.BlockSpec(wgt.shape, lambda b: (0, 0)))
    return pl.pallas_call(
        _transformer_kernel,
        out_shape=jax.ShapeDtypeStruct((B, N, Dm), jnp.float32),
        grid=(B,),
        in_specs=in_specs,
        out_specs=pl.BlockSpec((1, N, Dm), lambda b: (b, 0, 0)),
        compiler_params=pltpu.CompilerParams(
            dimension_semantics=("parallel",),
            vmem_limit_bytes=VMEM_LIMIT),
    )(tok.astype(jnp.float32), *weights)


# --------------------------- parameter construction --------------------------
def init_params(key):
    keys = iter(jax.random.split(key, 64))

    def nrm(shape, scale=0.02):
        return (scale * jax.random.normal(next(keys), shape)).astype(jnp.float32)

    params = {}
    # modality-specific encoders (1 conv per stage, no norm/nonlin, no bias)
    mod_enc = []
    for _m in range(INPUT_CHANNELS):
        stages, cin = [], 1
        for s in range(N_STAGES):
            cout = MOD_FEATURES[s]
            k = KERNEL_SIZES[s]
            stages.append(nrm((cout, cin, k, k, k)))
            cin = cout
        mod_enc.append(stages)
    params['mod_enc'] = mod_enc

    # learned bottleneck tokens (input_channels, C_mod_bottleneck, 4, 4, 4)
    params['tokens'] = jax.random.normal(
        next(keys), (INPUT_CHANNELS, MOD_FEATURES[-1], 4, 4, 4)).astype(jnp.float32)

    # Transformer(dim=128, depth=1, heads=4, dim_head=32, mlp_dim=256)
    D, MLP, inner = TR_DIM, TR_MLP, TR_INNER
    params['tr'] = {
        'pos':   (0.02 * jax.random.normal(next(keys), (TR_MAX_SEQ, D))).astype(jnp.float32),
        'ln1_g': jnp.ones((1, D), jnp.float32), 'ln1_b': jnp.zeros((1, D), jnp.float32),
        'w_qkv': nrm((D, 3 * inner)),                   # Linear(dim, 3*inner, bias=False)
        'w_out': nrm((inner, D)), 'b_out': jnp.zeros((1, D), jnp.float32),
        'ln2_g': jnp.ones((1, D), jnp.float32), 'ln2_b': jnp.zeros((1, D), jnp.float32),
        'w1': nrm((D, MLP)), 'b1': jnp.zeros((1, MLP), jnp.float32),
        'w2': nrm((MLP, D)), 'b2': jnp.zeros((1, D), jnp.float32),
        'lnf_g': jnp.ones((1, D), jnp.float32), 'lnf_b': jnp.zeros((1, D), jnp.float32),
    }

    # UNet decoder: transpconv(kernel=stride) -> cat skip -> conv -> 1x1 seg head
    transp, convs = [], []
    for s in range(1, N_STAGES):
        cin_below = FEATURES_PER_STAGE[-s]
        cskip = FEATURES_PER_STAGE[-(s + 1)]
        st = STRIDES[-s]
        transp.append(nrm((cin_below, cskip, st, st, st)))       # (Cin, Cout, s,s,s)
        k = KERNEL_SIZES[-(s + 1)]
        convs.append(nrm((cskip, 2 * cskip, k, k, k)))           # (Cout, Cin, k,k,k)
    params['dec'] = {
        'transp': transp,
        'conv': convs,
        'seg_w': nrm((NUM_CLASSES, FEATURES_PER_STAGE[0], 1, 1, 1)),
        'seg_b': jnp.zeros((NUM_CLASSES,), jnp.float32),
    }
    return params


def _block_diag_weights(w_list):
    """Merge per-modality conv filters into one block-diagonal filter
    (sum Cout, sum Cin, k, k, k) -- exactly equivalent to independent convs."""
    co_tot = sum(w.shape[0] for w in w_list)
    ci_tot = sum(w.shape[1] for w in w_list)
    k = w_list[0].shape[2]
    out = jnp.zeros((co_tot, ci_tot, k, k, k), jnp.float32)
    co = ci = 0
    for w in w_list:
        out = out.at[co:co + w.shape[0], ci:ci + w.shape[1]].set(w)
        co += w.shape[0]
        ci += w.shape[1]
    return out


# ------------------------------- forward pass --------------------------------
def decoder_forward(dec, skips):
    x = skips[-1]
    n_dec = len(skips) - 1
    for s in range(1, n_dec + 1):
        x = conv_transpose3d_cl(x, dec['transp'][s - 1], stride=STRIDES[-s])
        x = jnp.concatenate([x, skips[-(s + 1)]], axis=-1)
        last = (s == n_dec)
        x = conv3d_cl(x, dec['conv'][s - 1], stride=1,
                      padding=KERNEL_SIZES[-(s + 1)] // 2,
                      head_w=dec['seg_w'] if last else None,
                      head_b=dec['seg_b'] if last else None)
    return x   # f32 seg logits, channel-last (head fused into final conv)


def multimodal_recon_forward(params, x, selected_mask):
    """x: (B, input_channels, D, H, W) NCDHW (PyTorch convention)."""
    B = x.shape[0]
    m = INPUT_CHANNELS

    # merged (block-diagonal) per-modality encoders: one conv call per stage,
    # channels laid out modality-major (mod0 feats, mod1 feats) -- matches the
    # module's per-stage (m, c) -> channel flattening.
    h = jnp.transpose(x, (0, 2, 3, 4, 1)).astype(jnp.bfloat16)   # (B, D, H, W, m)
    skips_comb = []
    for s in range(N_STAGES):
        w_bd = _block_diag_weights([params['mod_enc'][j][s] for j in range(m)])
        h = conv3d_cl(h, w_bd, stride=STRIDES[s], padding=KERNEL_SIZES[s] // 2)
        skips_comb.append(h)

    Cb = MOD_FEATURES[-1]
    bott = skips_comb[-1]                                         # (B, bd, bh, bw, m*Cb)
    bd, bh, bw = bott.shape[1:4]

    # ground-truth bottleneck (B, m, C, h, w, d) channel-major, as in the module
    reconstructed_gt = jnp.transpose(
        bott.astype(jnp.float32).reshape(B, bd, bh, bw, m, Cb), (0, 4, 5, 1, 2, 3))

    # substitute learned tokens for missing modalities at the bottleneck
    bneck = []
    for j, present in enumerate(selected_mask):
        if present:
            bneck.append(bott[..., j * Cb:(j + 1) * Cb])
        else:
            tok_j = jnp.transpose(params['tokens'][j], (1, 2, 3, 0))         # (4,4,4,C)
            bneck.append(jnp.broadcast_to(tok_j, (B,) + tok_j.shape))

    # rearrange 'b m c h w d -> b (m h w d) c' == plain reshape for channel-last
    tok = jnp.concatenate(
        [t.reshape(B, bd * bh * bw, Cb).astype(jnp.float32) for t in bneck], axis=1)
    tok_rec = transformer_forward(tok, params['tr'])                          # (B, m*64, C)
    rec = tok_rec.reshape(B, m, bd, bh, bw, Cb)

    for j, present in enumerate(selected_mask):
        if not present:
            bneck[j] = rec[:, j]
    bottleneck_cl = jnp.concatenate([t.astype(jnp.bfloat16) for t in bneck], axis=-1)

    # shallow skips: zero missing modalities (channel mask over the modality-major layout)
    skips = []
    for i in range(N_STAGES - 1):
        mask_vec = jnp.repeat(jnp.asarray(selected_mask, jnp.bfloat16), MOD_FEATURES[i])
        skips.append(skips_comb[i] * mask_vec)
    skips.append(bottleneck_cl)

    seg_cl = decoder_forward(params['dec'], skips)                            # (B,D,H,W,cls)
    seg = jnp.transpose(seg_cl, (0, 4, 1, 2, 3))
    final_bottleneck = jnp.transpose(bottleneck_cl.astype(jnp.float32), (0, 4, 1, 2, 3))
    return seg, final_bottleneck, reconstructed_gt


# ------------------------------------ main ------------------------------------
if __name__ == "__main__":
    key = jax.random.PRNGKey(0)
    kp, kx = jax.random.split(key)
    params = init_params(kp)

    # (B, input_channels, D, H, W); bottleneck after 2 stages (strides 1,2) is 4x4x4
    x = jax.random.normal(kx, (2, INPUT_CHANNELS, 8, 8, 8), dtype=jnp.float32)
    selected_mask = [True, False]   # modality 1 "missing" -> token + reconstruction path

    seg, final_bottleneck, gt_bottleneck = multimodal_recon_forward(params, x, selected_mask)
    jax.block_until_ready((seg, final_bottleneck, gt_bottleneck))

    assert seg.shape == (2, NUM_CLASSES, 8, 8, 8)
    assert final_bottleneck.shape == (2, FEATURES_PER_STAGE[-1], 4, 4, 4)
    assert gt_bottleneck.shape == (2, INPUT_CHANNELS, MOD_FEATURES[-1], 4, 4, 4)
    assert bool(jnp.all(jnp.isfinite(seg)))
    print("KERNEL_OK")
</pallas_src>

<mosaic_0001>
module attributes {stable_mosaic.version = 11 : i64} {
  func.func @kernel(%arg0: i32, %arg1: i32, %arg2: memref<1x1x512x54xbf16, #tpu.memory_space<vmem>>, %arg3: memref<1x54x32xbf16, #tpu.memory_space<vmem>>, %arg4: memref<1x512x32xbf16, #tpu.memory_space<vmem>>) attributes {dimension_semantics = [#tpu.dimension_semantics<parallel>, #tpu.dimension_semantics<parallel>], iteration_bounds = array<i64: 2, 1>, scalar_prefetch = 0 : i64, scratch_operands = 0 : i64, tpu.core_type = #tpu.core_type<tc>, window_params = [{pipeline_mode = #tpu.pipeline_mode<synchronous>, transform_indices = @transform_0, window_bounds = array<i64: 1, 1, 512, 54>}, {pipeline_mode = #tpu.pipeline_mode<synchronous>, transform_indices = @transform_1, window_bounds = array<i64: 1, 54, 32>}, {transform_indices = @transform_2, window_bounds = array<i64: 1, 512, 32>}]} {
    %c512_i32 = arith.constant 512 : i32
    %0 = arith.muli %arg1, %c512_i32 : i32
    %1 = tpu.assume_multiple %0, 512 : i32
    %cst = arith.constant 0.000000e+00 : f32
    %2 = vector.broadcast %cst : f32 to vector<512x32xf32>
    %c0_i32 = arith.constant 0 : i32
    %3 = arith.addi %1, %c0_i32 : i32
    %c0 = arith.constant 0 : index
    %c0_0 = arith.constant 0 : index
    %4 = arith.index_cast %3 : i32 to index
    %c0_1 = arith.constant 0 : index
    %5 = vector.load %arg2[%c0, %c0_0, %4, %c0_1] : memref<1x1x512x54xbf16, #tpu.memory_space<vmem>>, vector<1x1x512x54xbf16>
    %6 = vector.shape_cast %5 : vector<1x1x512x54xbf16> to vector<512x54xbf16>
    %c0_2 = arith.constant 0 : index
    %c0_3 = arith.constant 0 : index
    %c0_4 = arith.constant 0 : index
    %7 = vector.load %arg3[%c0_2, %c0_3, %c0_4] : memref<1x54x32xbf16, #tpu.memory_space<vmem>>, vector<1x54x32xbf16>
    %8 = vector.shape_cast %7 : vector<1x54x32xbf16> to vector<54x32xbf16>
    %cst_5 = arith.constant dense<0.000000e+00> : vector<512x32xf32>
    %9 = tpu.matmul %6, %8, %cst_5 {dimension_numbers = #tpu.dot_dimension_numbers<[1], [0], [0], [1], [0, 0, 1, 1], [], []>} : vector<512x54xbf16>, vector<54x32xbf16>, vector<512x32xf32> -> vector<512x32xf32>
    %10 = arith.addf %2, %9 : vector<512x32xf32>
    %11 = arith.truncf %10 : vector<512x32xf32> to vector<512x32xbf16>
    %c0_6 = arith.constant 0 : index
    %c0_7 = arith.constant 0 : index
    %c0_8 = arith.constant 0 : index
    %12 = vector.load %arg4[%c0_6, %c0_7, %c0_8] : memref<1x512x32xbf16, #tpu.memory_space<vmem>>, vector<1x512x32xbf16>
    %13 = vector.shape_cast %12 : vector<1x512x32xbf16> to vector<512x32xbf16>
    %14 = vector.shape_cast %11 : vector<512x32xbf16> to vector<1x512x32xbf16>
    tpu.vector_store %arg4[%c0_6, %c0_7, %c0_8], %14 {strides = array<i32>} : memref<1x512x32xbf16, #tpu.memory_space<vmem>>, vector<1x512x32xbf16>,
    return
  }
  func.func @transform_0(%arg0: i32, %arg1: i32) -> (i32, i32, i32, i32) {
    %c0_i32 = arith.constant 0 : i32
    %c0_i32_0 = arith.constant 0 : i32
    %c0_i32_1 = arith.constant 0 : i32
    %c0_i32_2 = arith.constant 0 : i32
    return %arg0, %c0_i32, %c0_i32_0, %c0_i32_1 : i32, i32, i32, i32
  }
  func.func @transform_1(%arg0: i32, %arg1: i32) -> (i32, i32, i32) {
    %c0_i32 = arith.constant 0 : i32
    %c0_i32_0 = arith.constant 0 : i32
    %c0_i32_1 = arith.constant 0 : i32
    %c0_i32_2 = arith.constant 0 : i32
    return %c0_i32, %c0_i32_0, %c0_i32_1 : i32, i32, i32
  }
  func.func @transform_2(%arg0: i32, %arg1: i32) -> (i32, i32, i32) {
    %c0_i32 = arith.constant 0 : i32
    %c0_i32_0 = arith.constant 0 : i32
    return %arg0, %arg1, %c0_i32 : i32, i32, i32
  }
}

module attributes {stable_mosaic.version = 11 : i64} {
  func.func @kernel(%arg0: i32, %arg1: i32, %arg2: memref<1x1x512x54xbf16, #tpu.memory_space<vmem>>, %arg3: memref<1x54x32xbf16, #tpu.memory_space<vmem>>, %arg4: memref<1x512x32xbf16, #tpu.memory_space<vmem>>) attributes {dimension_semantics = [#tpu.dimension_semantics<parallel>, #tpu.dimension_semantics<parallel>], iteration_bounds = array<i64: 2, 1>, scalar_prefetch = 0 : i64, scratch_operands = 0 : i64, tpu.core_type = #tpu.core_type<tc>, window_params = [{transform_indices = @transform_0, window_bounds = array<i64: 1, 1, 512, 54>}, {pipeline_mode = #tpu.pipeline_mode<synchronous>, transform_indices = @transform_1, window_bounds = array<i64: 1, 54, 32>}, {transform_indices = @transform_2, window_bounds = array<i64: 1, 512, 32>}]} {
    %c512_i32 = arith.constant 512 : i32
    %0 = arith.muli %arg1, %c512_i32 : i32
    %1 = tpu.assume_multiple %0, 512 : i32
    %cst = arith.constant 0.000000e+00 : f32
    %2 = vector.broadcast %cst : f32 to vector<512x32xf32>
    %c0_i32 = arith.constant 0 : i32
    %3 = arith.addi %1, %c0_i32 : i32
    %c0 = arith.constant 0 : index
    %c0_0 = arith.constant 0 : index
    %4 = arith.index_cast %3 : i32 to index
    %c0_1 = arith.constant 0 : index
    %5 = vector.load %arg2[%c0, %c0_0, %4, %c0_1] : memref<1x1x512x54xbf16, #tpu.memory_space<vmem>>, vector<1x1x512x54xbf16>
    %6 = vector.shape_cast %5 : vector<1x1x512x54xbf16> to vector<512x54xbf16>
    %c0_2 = arith.constant 0 : index
    %c0_3 = arith.constant 0 : index
    %c0_4 = arith.constant 0 : index
    %7 = vector.load %arg3[%c0_2, %c0_3, %c0_4] : memref<1x54x32xbf16, #tpu.memory_space<vmem>>, vector<1x54x32xbf16>
    %8 = vector.shape_cast %7 : vector<1x54x32xbf16> to vector<54x32xbf16>
    %cst_5 = arith.constant dense<0.000000e+00> : vector<512x32xf32>
    %9 = tpu.matmul %6, %8, %cst_5 {dimension_numbers = #tpu.dot_dimension_numbers<[1], [0], [0], [1], [0, 0, 1, 1], [], []>} : vector<512x54xbf16>, vector<54x32xbf16>, vector<512x32xf32> -> vector<512x32xf32>
    %10 = arith.addf %2, %9 : vector<512x32xf32>
    %11 = arith.truncf %10 : vector<512x32xf32> to vector<512x32xbf16>
    %c0_6 = arith.constant 0 : index
    %c0_7 = arith.constant 0 : index
    %c0_8 = arith.constant 0 : index
    %12 = vector.load %arg4[%c0_6, %c0_7, %c0_8] : memref<1x512x32xbf16, #tpu.memory_space<vmem>>, vector<1x512x32xbf16>
    %13 = vector.shape_cast %12 : vector<1x512x32xbf16> to vector<512x32xbf16>
    %14 = vector.shape_cast %11 : vector<512x32xbf16> to vector<1x512x32xbf16>
    tpu.vector_store %arg4[%c0_6, %c0_7, %c0_8], %14 {strides = array<i32>} : memref<1x512x32xbf16, #tpu.memory_space<vmem>>, vector<1x512x32xbf16>,
    return
  }
  func.func @transform_0(%arg0: i32, %arg1: i32) -> (i32, i32, i32, i32) {
    %c0_i32 = arith.constant 0 : i32
    %c0_i32_0 = arith.constant 0 : i32
    %c0_i32_1 = arith.constant 0 : i32
    %c0_i32_2 = arith.constant 0 : i32
    return %arg0, %c0_i32, %c0_i32_0, %c0_i32_1 : i32, i32, i32, i32
  }
  func.func @transform_1(%arg0: i32, %arg1: i32) -> (i32, i32, i32) {
    %c0_i32 = arith.constant 0 : i32
    %c0_i32_0 = arith.constant 0 : i32
    %c0_i32_1 = arith.constant 0 : i32
    %c0_i32_2 = arith.constant 0 : i32
    return %c0_i32, %c0_i32_0, %c0_i32_1 : i32, i32, i32
  }
  func.func @transform_2(%arg0: i32, %arg1: i32) -> (i32, i32, i32) {
    %c0_i32 = arith.constant 0 : i32
    %c0_i32_0 = arith.constant 0 : i32
    return %arg0, %arg1, %c0_i32 : i32, i32, i32
  }
}

</mosaic_0001>

<bundles_post_ra>
// kernel: tpu_custom_call.1
= control target key start
LH: loop header
LB: loop body
LE: loop exit
PB: predicated region body
PF: predicated region fallthrough
CT: control target
= control target key end

     0   :  { %7 = vsyncpa [#allocation3], 0  ;;  %s2232_s0 = inlined_call_operand.hbm [shape: bf16[2,1,512,54], index: 0, kind: input, shape index: {}]   ;;  %s2233_s1 = inlined_call_operand.hbm [shape: bf16[1,54,32], index: 1, kind: input, shape index: {}]   ;;  %s2234_s2 = inlined_call_operand.hbm [shape: bf16[2,512,32], index: 2, kind: output, shape index: {}]  }
   0x1   :  { %8 = vsyncpa [#allocation6], 0 }
   0x2   :  { %9 = vsyncpa [#allocation4], 0 }
   0x3   :  { %11 = vsyncpa [#allocation4 + $0x1], 0  ;;  %s1857_s9 = smov 0   ;;  %s1859_s10 = smov 0  }
   0x4   :  { %s1861_s11 = smov 0   ;;  %s1863_s12 = smov 0  }
   0x5   :  { %s1865_s13 = smov 0   ;;  %s1867_s14 = smov 0  }
   0x6 LB: > { %s1247_s15 = sadd.s32 4294967295, %s1833_s14   ;;  %s1248_s16 = sadd.s32 4294967294, %s1833_s14   ;;  %s1833_s14 = sphi %s1867_s14, %s17_s14   ;;  %s1829_s13 = sphi %s1865_s13, %s2259_s13   ;;  %s1825_s12 = sphi %s1863_s12, %s2258_s12   ;;  %s1821_s11 = sphi %s1861_s11, %s2257_s11   ;;  %s1817_s10 = sphi %s1859_s10, %s2256_s10   ;;  %s1813_s9 = sphi %s1857_s9, %s2255_s9  }
   0x7   : > { %s29_s17 = sadd.s32 1, %s1829_s13  ;;  %s36_s18 = sadd.s32 1, %s1821_s11 }
   0x8   : > { %p31_p0 = scmp.ge.s32.totalorder %s29_s17, 2  ;;  %p49_p1 = scmp.ne.s32.totalorder %s1817_s10, %s1813_s9 }
   0x9   : > { %p1893_p2 = scmp.eq.s32.totalorder %s1247_s15, 0  ;;  %p95_p3 = scmp.ne.s32.totalorder %s1821_s11, %s1817_s10 }
   0xa   : > { %s2261_s17 = smov (%p31_p0, %s29_s17), 0  ;;  %p96_p5 = scmp.eq.s32.totalorder %s1247_s15, 1 }
   0xb   : > { %s2242_s19 = scalar_select %p1893_p2, 1, 0 }
   0xc   : > { %p1903_p4 = por %p1893_p2, %p49_p1  ;;  %s33_s21 = ssub.s32 %s1829_s13, %s2261_s17 }
   0xd   : > { %p102_p6 = scmp.eq.s32.totalorder %s1248_s16, 1  ;;  %p34_p7 = scmp.eq.s32.totalorder %s33_s21, 0 }
   0xe   : > { %s2243_s20 = scalar_select %p1903_p4, 1, 0 }
   0xf   : > { %p1909_p8 = por %p96_p5, %p95_p3  ;;  %p1913_p9 = por %p102_p6, %p49_p1 }
  0x10   : > { %p1249_p10 = scmp.ge.s32.totalorder %s1833_s14, 1  ;;  %p109_p11 = scmp.lt.s32.totalorder %s1833_s14, 3 }
  0x11   : > { %s2244_s22 = scalar_select %p1909_p8, 1, 0 }
  0x12   : > { %s2245_s23 = scalar_select %p1913_p9, 1, 0 }
  0x13   : > { %s1919_s24 = scalar_select %p34_p7, %s1821_s11, %s36_s18  }
  0x14   : > { %s1393_s25 = sshll.u32 %s1825_s12, 12  ;;  %p1930_p12 = pnand %p1249_p10, %p109_p11 }
  0x15   : > { %s1928_s28 = scalar_lea.hbm %s2232_s0, %s1393_s25  ;;  %s1835_s30 = smov [#allocation2]  }
  0x16   : > { %s2246_s29 = scalar_select %p1930_p12, 1, 0 }
  0x17   : > { %s124_s3 = sshll.u32 %s1835_s30, 4  ;;  %p1585_p13 = pneg %p1930_p12  ;;  %s1934_s3 = int_to_ptr.vmem [resolvable:$true] %s124_s3 }
  0x18   : > { %s1836_s5 = smov [#allocation5]   ;;  %s1689_s8 = scalar_lea.hbm %s1928_s28, 4096 }
  0x19   : > { %p1940_p0 = pnand %p1585_p13, %p1903_p4  ;;  %s137_s6 = sshll.u32 %s1836_s5, 4  ;;  %s1950_s6 = int_to_ptr.vmem [resolvable:$true] %s137_s6 }
  0x1a   : > { %p1946_p1 = pnand %p1585_p13, %p1893_p2  ;;  %p1690_p3 = scmp.ne.s32.totalorder %s1928_s28, %s1689_s8 }
  0x1b   : > { %p1691_p5 = pneg %p1940_p0  ;;  %s1694_s18 = scalar_lea.hbm %s2232_s0, 8192 }
  0x1c   : > { %s2248_s7 = scalar_select %p1946_p1, 1, 0 }
  0x1d   : > { %p1692_p6 = pnand %p1691_p5, %p1690_p3  ;;  %p1695_p10 = scmp.lt.u32.totalorder %s1928_s28, %s2232_s0 }
  0x1e   : > { %p1696_p11 = scmp.lt.u32.totalorder %s1694_s18, %s1689_s8  ;;  %p1698_p9 = scmp.lt.u32.totalorder %s1689_s8, %s1928_s28 }
  0x1f   : > { %p1693_p7 = pneg %p1692_p6 }
  0x20   : > { %p1697_p13 = por %p1696_p11, %p1695_p10 }
  0x22   : > { %p1699_p8 = por %p1698_p9, %p1697_p13 }
  0x24   : > { %p1700_p2 = pnand %p1699_p8, %p1693_p7 }
  0x26   : > { %1703 = shalt.err (!%p1700_p2)
}
  0x27   : > { %s1704_s27 = scalar_lea.vmem %s1934_s3, 4096  ;;  %p1712_p12 = scmp.lt.s32.totalorder %s1934_s3, %s1934_s3 }
  0x28   : > { %p1705_p3 = scmp.ne.s32.totalorder %s1934_s3, %s1704_s27  ;;  %p1713_p1 = scmp.lt.s32.totalorder %s1704_s27, %s1704_s27 }
  0x2a   : > { %p1707_p6 = pnand %p1705_p3, %p1691_p5  ;;  %p1714_p10 = por %p1713_p1, %p1712_p12 }
  0x2c   : > { %p1708_p4 = pneg %p1707_p6 }
  0x2e   : > { %p1715_p11 = pnand %p1714_p10, %p1708_p4 }
  0x30   : > { %1718 = shalt.err (!%p1715_p11)
}
  0x31   : > { %s1837_s30 = smov 64   ;;  %s1838_s5 = smov 4  }
  0x32   : > { %1588 = dma.hbm_to_vmem [thread:$0]  (!%p1940_p0), %s1928_s28, 4096, %s1934_s3, [#allocation3], %s1837_s30, %s1837_s30, %s1838_s5  }
  0x33   : > { %s1719_s16 = scalar_lea.hbm %s2233_s1, 448  ;;  %p2249_p8 = scmp.ne.s32.totalorder %s2248_s7, 0 }
  0x34   : > { %p1720_p2 = scmp.ne.s32.totalorder %s2233_s1, %s1719_s16  ;;  %p1726_p1 = scmp.lt.u32.totalorder %s1719_s16, %s2233_s1 }
  0x35   : > { %p1721_p9 = pneg %p2249_p8 }
  0x37   : > { %p1722_p4 = pnand %p1721_p9, %p1720_p2 }
  0x39   : > { %p1723_p12 = pneg %p1722_p4 }
  0x3b   : > { %p1728_p5 = pnand %p1726_p1, %p1723_p12 }
  0x3d   : > { %1731 = shalt.err (!%p1728_p5)
}
  0x3e   : > { %s1732_s28 = scalar_lea.vmem %s1950_s6, 448  ;;  %p1740_p3 = scmp.lt.s32.totalorder %s1950_s6, %s1950_s6 }
  0x3f   : > { %p1733_p0 = scmp.ne.s32.totalorder %s1950_s6, %s1732_s28  ;;  %p1741_p6 = scmp.lt.s32.totalorder %s1732_s28, %s1732_s28 }
  0x41   : > { %p1735_p7 = pnand %p1733_p0, %p1721_p9  ;;  %p1742_p10 = por %p1741_p6, %p1740_p3 }
  0x43   : > { %p1736_p13 = pneg %p1735_p7 }
  0x45   : > { %p1743_p11 = pnand %p1742_p10, %p1736_p13 }
  0x47   : > { %1746 = shalt.err (!%p1743_p11)
}
  0x48   : > { %1591 = dma.hbm_to_vmem [thread:$0]  (!%p2249_p8), %s2233_s1, 448, %s1950_s6, [#allocation6], %s1837_s30, %s1837_s30, %s1838_s5  }
  0x49   : > { %p2250_p2 = scmp.ne.s32.totalorder %s2246_s29, 0 }
  0x4a   : > { %p2251_p4 = scmp.ne.s32.totalorder (!%p2250_p2), %s2243_s20, 0 }
  0x4b   : > { %153 = sbr.rel (%p2250_p2) target bundleno = 391 (0x187), region = 28 }
  0x52   : > { %1800 = dma.done.wait (%p2251_p4), [#allocation3], 4096  }
  0x53   : > { %1802 = vsyncadd (%p2251_p4), [#allocation3], 4294963200  ;;  %p2252_p9 = scmp.ne.s32.totalorder %s2242_s19, 0 }
  0x55   : > { %1804 = dma.done.wait (%p2252_p9), [#allocation6], 448  }
  0x56   : > { %1806 = vsyncadd (%p2252_p9), [#allocation6], 4294966848  ;;  %v1653_v0 = vld [vmem:[#allocation5] sm:$0xff]   ;;  %v1654_v1 = vld [vmem:[#allocation5 + $0x8] sm:$0xff]   ;;  %vm433_vm0 = vcmask 441344   ;;  %vm530_vm1 = vcmask 1042432   ;;  %s2168_s5 = scalar_lea.hbm %s2234_s2, %s1393_s25 }
  0x57   : > { %1495 = vmatprep.subr.bf16.mxu0 %v1653_v0  ;;  %1567 = vmatprep.subr.bf16.mxu1 %v1653_v0  ;;  %v1655_v2 = vld [vmem:[#allocation5 + $0x10] sm:$0xff]   ;;  %v1657_v3 = vld [vmem:[#allocation2] sm:$0xff]   ;;  %v1656_v5 = vld [vmem:[#allocation5 + $0x18] ss:$0 sps:$4 sm:$0x77]   ;;  %s171_s19 = sand.u32 1, %s1817_s10  }
  0x58   : > { %1496 = vmatpush3.bf16.msra.mxu0 %v1653_v0  ;;  %1571 = vmatpush3.bf16.msra.mxu1 %v1653_v0  ;;  %v1658_v4 = vld [vmem:[#allocation2 + $0x80] sm:$0xff]   ;;  %v532_v6 = vsel %vm530_vm1, %v1656_v5, 0  ;;  %v1659_v7 = vld [vmem:[#allocation2 + $0x8] sm:$0xff]   ;;  %v1661_v9 = vld [vmem:[#allocation2 + $0x10] sm:$0xff]   ;;  %s1255_s20 = sshll.u32 %s171_s19, 8  ;;  %vm1079_vm2 = vcmask 257024  }
  0x59   : > { %1497 = vmatprep.subr.bf16.mxu0 %v1654_v1  ;;  %1568 = vmatprep.subr.bf16.mxu1 %v1654_v1  ;;  %v1660_v8 = vld [vmem:[#allocation2 + $0x88] sm:$0xff]   ;;  %v1662_v10 = vld [vmem:[#allocation2 + $0x90] sm:$0xff]   ;;  %v1663_v11 = vld [vmem:[#allocation2 + $0x18] sm:$0xff]   ;;  %s2044_s29 = scalar_lea.vmem [#allocation7], %s1255_s20  ;;  %s2186_s12 = scalar_lea.sflag [#allocation4], %s171_s19 }
  0x5a   : > { %1503 = vmatprep.mubr.msk.bf16.mxu0 %vm433_vm0, %v1657_v3  ;;  %1535 = vmatprep.mubr.msk.bf16.mxu1 %vm433_vm0, %v1658_v4  ;;  %v1664_v12 = vld [vmem:[#allocation2 + $0x98] sm:$0xff]   ;;  %v1665_v13 = vld [vmem:[#allocation2 + $0x20] sm:$0xff]   ;;  %v1667_v15 = vld [vmem:[#allocation2 + $0x28] sm:$0xff]   ;;  %s1160_s6 = sshll.u32 %s2044_s29, 4  ;;  %p2253_p12 = scmp.ne.s32.totalorder %s2244_s22, 0  ;;  %s2170_s6 = int_to_ptr.vmem [resolvable:$true] %s1160_s6 }
  0x5b   : > { %v1666_v14 = vld [vmem:[#allocation2 + $0xa0] sm:$0xff]   ;;  %v1668_v16 = vld [vmem:[#allocation2 + $0xa8] sm:$0xff]   ;;  %v1669_v17 = vld [vmem:[#allocation2 + $0x30] sm:$0xff]   ;;  %s1747_s25 = scalar_lea.vmem %s2170_s6, 4096  ;;  %s1839_s8 = smov [#allocation7]  }
  0x5c   : > { %1498 = vmatpush3.bf16.msra.mxu0 %v1654_v1  ;;  %1572 = vmatpush3.bf16.msra.mxu1 %v1654_v1  ;;  %v1670_v18 = vld [vmem:[#allocation2 + $0xb0] sm:$0xff]   ;;  %v1671_v19 = vld [vmem:[#allocation2 + $0x38] sm:$0xff]   ;;  %v1673_v21 = vld [vmem:[#allocation2 + $0x40] sm:$0xff]   ;;  %p1748_p8 = scmp.ne.s32.totalorder %s2170_s6, %s1747_s25  ;;  %s1751_s15 = sshll.u32 %s1839_s8, 4  ;;  %s1752_s15 = int_to_ptr.vmem [resolvable:$false] %s1751_s15 }
  0x5d   : > { %1499 = vmatprep.subr.bf16.mxu0 %v1655_v2  ;;  %1569 = vmatprep.subr.bf16.mxu1 %v1655_v2  ;;  %v1672_v20 = vld [vmem:[#allocation2 + $0xb8] sm:$0xff]   ;;  %v1674_v22 = vld [vmem:[#allocation2 + $0xc0] sm:$0xff]   ;;  %v1675_v23 = vld [vmem:[#allocation2 + $0x48] sm:$0xff]   ;;  %s1753_s16 = scalar_lea.vmem %s1752_s15, 8192  ;;  %p1754_p0 = scmp.lt.s32.totalorder %s2170_s6, %s1752_s15 }
  0x5e   : > { %v1676_v24 = vld [vmem:[#allocation2 + $0xc8] sm:$0xff]   ;;  %v1677_v25 = vld [vmem:[#allocation2 + $0x50] sm:$0xff]   ;;  %v1679_v27 = vld [vmem:[#allocation2 + $0x58] sm:$0xff]   ;;  %p1749_p1 = pnand %p1748_p8, %p2253_p12  ;;  %p1755_p7 = scmp.lt.s32.totalorder %s1753_s16, %s1747_s25 }
  0x5f   : > { %v1678_v26 = vld [vmem:[#allocation2 + $0xd0] sm:$0xff]   ;;  %v1680_v28 = vld [vmem:[#allocation2 + $0xd8] sm:$0xff]   ;;  %v1681_v29 = vld [vmem:[#allocation2 + $0x60] sm:$0xff]  }
  0x60   : > { %1500 = vmatpush3.bf16.msra.mxu0 %v1655_v2  ;;  %1573 = vmatpush3.bf16.msra.mxu1 %v1655_v2  ;;  %v1682_v30 = vld [vmem:[#allocation2 + $0xe0] sm:$0xff]   ;;  %v1683_v31 = vld [vmem:[#allocation2 + $0x68] sm:$0xff]   ;;  %v1685_v33 = vld [vmem:[#allocation2 + $0x70] sm:$0xff]   ;;  %p1750_p5 = pneg %p1749_p1  ;;  %p1756_p13 = por %p1755_p7, %p1754_p0 }
  0x61   : > { %1575 = vmatprep.subr.msk.bf16.mxu0 %vm530_vm1, %v1656_v5  ;;  %1576 = vmatprep.subr.msk.bf16.mxu1 %vm530_vm1, %v1656_v5  ;;  %v1684_v32 = vld [vmem:[#allocation2 + $0xe8] sm:$0xff]   ;;  %v1686_v34 = vld [vmem:[#allocation2 + $0xf0] sm:$0xff]   ;;  %v1687_v35 = vld [vmem:[#allocation2 + $0x78] sm:$0xff]  }
  0x62   : > { %v1688_v36 = vld [vmem:[#allocation2 + $0xf8] sm:$0xff]   ;;  %p1757_p3 = pnand %p1756_p13, %p1750_p5 }
  0x64   : > { %1502 = vmatpush3.bf16.msra.mxu0 %v532_v6  ;;  %1574 = vmatpush3.bf16.msra.mxu1 %v532_v6 }
  0x67   : > { %1504 = vmatmul.mubr.msk.bf16.vlgmr.msra.gmra.mrb[0].mxu0 %vm433_vm0, %v1659_v7  ;;  %1536 = vmatmul.mubr.msk.bf16.vlgmr.msra.gmra.mrb[0].mxu1 %vm433_vm0, %v1660_v8 }
  0x68   : > { %1507 = vmatprep.mubr.msk.bf16.mxu0 %vm433_vm0, %v1661_v9  ;;  %1539 = vmatprep.mubr.msk.bf16.mxu1 %vm433_vm0, %v1662_v10 }
  0x6f   : > { %1508 = vmatmul.mubr.msk.bf16.gmra.mrb[4].mxu0 %vm433_vm0, %v1663_v11  ;;  %1540 = vmatmul.mubr.msk.bf16.gmra.mrb[4].mxu1 %vm433_vm0, %v1664_v12 }
  0x70   : > { %1511 = vmatprep.mubr.msk.bf16.mxu0 %vm433_vm0, %v1665_v13  ;;  %1543 = vmatprep.mubr.msk.bf16.mxu1 %vm433_vm0, %v1666_v14 }
  0x77   : > { %1512 = vmatmul.mubr.msk.bf16.gmra.mrb[8].mxu0 %vm433_vm0, %v1667_v15  ;;  %1544 = vmatmul.mubr.msk.bf16.gmra.mrb[8].mxu1 %vm433_vm0, %v1668_v16 }
  0x78   : > { %1515 = vmatprep.mubr.msk.bf16.mxu0 %vm433_vm0, %v1669_v17  ;;  %1547 = vmatprep.mubr.msk.bf16.mxu1 %vm433_vm0, %v1670_v18 }
  0x7f   : > { %1516 = vmatmul.mubr.msk.bf16.gmra.mrb[12].mxu0 %vm433_vm0, %v1671_v19  ;;  %1548 = vmatmul.mubr.msk.bf16.gmra.mrb[12].mxu1 %vm433_vm0, %v1672_v20 }
  0x80   : > { %1519 = vmatprep.mubr.msk.bf16.mxu0 %vm433_vm0, %v1673_v21  ;;  %1551 = vmatprep.mubr.msk.bf16.mxu1 %vm433_vm0, %v1674_v22 }
  0x87   : > { %1520 = vmatmul.mubr.msk.bf16.gmra.mrb[16].mxu0 %vm433_vm0, %v1675_v23  ;;  %1552 = vmatmul.mubr.msk.bf16.gmra.mrb[16].mxu1 %vm433_vm0, %v1676_v24 }
  0x88   : > { %1523 = vmatprep.mubr.msk.bf16.mxu0 %vm433_vm0, %v1677_v25  ;;  %1555 = vmatprep.mubr.msk.bf16.mxu1 %vm433_vm0, %v1678_v26 }
  0x8f   : > { %1524 = vmatmul.mubr.msk.bf16.gmra.mrb[20].mxu0 %vm433_vm0, %v1679_v27  ;;  %1556 = vmatmul.mubr.msk.bf16.gmra.mrb[20].mxu1 %vm433_vm0, %v1680_v28 }
  0x90   : > { %1527 = vmatprep.mubr.msk.bf16.mxu0 %vm433_vm0, %v1681_v29  ;;  %1559 = vmatprep.mubr.msk.bf16.mxu1 %vm433_vm0, %v1682_v30 }
  0x97   : > { %1528 = vmatmul.mubr.msk.bf16.gmra.mrb[24].mxu0 %vm433_vm0, %v1683_v31  ;;  %1560 = vmatmul.mubr.msk.bf16.gmra.mrb[24].mxu1 %vm433_vm0, %v1684_v32 }
  0x98   : > { %1531 = vmatprep.mubr.msk.bf16.mxu0 %vm433_vm0, %v1685_v33  ;;  %1563 = vmatprep.mubr.msk.bf16.mxu1 %vm433_vm0, %v1686_v34 }
  0x9f   : > { %1532 = vmatmul.mubr.msk.bf16.gmra.mrb[28].mxu0 %vm433_vm0, %v1687_v35  ;;  %1564 = vmatmul.mubr.msk.bf16.gmra.mrb[28].mxu1 %vm433_vm0, %v1688_v36 }
 0x13a   : > { %v1505_v37 = vpop.f32.mrb[0].mxu0  ;;  %v1537_v38 = vpop.f32.mrb[0].mxu1 }
 0x13b   : > { %v1396_v39 = vpack.c.bf16 %v1505_v37, %v1505_v37  ;;  %v1428_v40 = vpack.c.bf16 %v1537_v38, %v1537_v38  ;;  %v568_v41 = vpop.f32.mrb[1].mxu0  ;;  %v696_v42 = vpop.f32.mrb[1].mxu1 }
 0x13c   : > { %v1394_v43 = vpack.c.bf16 %v568_v41, %v568_v41  ;;  %v1426_v44 = vpack.c.bf16 %v696_v42, %v696_v42  ;;  %v1506_v45 = vpop.f32.mrb[2].mxu0  ;;  %v1538_v46 = vpop.f32.mrb[2].mxu1 }
 0x13d   : > { %1082 = vst.msk [vmem:[%s2044_s29 + $0x8] sm:$0xf] %vm1079_vm2, %v1396_v39  ;;  %1114 = vst.msk [vmem:[%s2044_s29 + $0x88] sm:$0xf] %vm1079_vm2, %v1428_v40  ;;  %v1397_v47 = vpack.c.bf16 %v1506_v45, %v1506_v45  ;;  %v1429_v48 = vpack.c.bf16 %v1538_v46, %v1538_v46  ;;  %v571_v49 = vpop.f32.mrb[3].mxu0  ;;  %v699_v50 = vpop.f32.mrb[3].mxu1 }
 0x13e   : > { %1080 = vst.msk [vmem:[%s2044_s29] sm:$0xf] %vm1079_vm2, %v1394_v43  ;;  %1112 = vst.msk [vmem:[%s2044_s29 + $0x80] sm:$0xf] %vm1079_vm2, %v1426_v44  ;;  %v1395_v51 = vpack.c.bf16 %v571_v49, %v571_v49  ;;  %v1427_v52 = vpack.c.bf16 %v699_v50, %v699_v50 }
 0x13f   : > { %1083 = vst.msk [vmem:[%s2044_s29 + $0xc] sm:$0xf] %vm1079_vm2, %v1397_v47  ;;  %1115 = vst.msk [vmem:[%s2044_s29 + $0x8c] sm:$0xf] %vm1079_vm2, %v1429_v48 }
 0x140   : > { %1081 = vst.msk [vmem:[%s2044_s29 + $0x4] sm:$0xf] %vm1079_vm2, %v1395_v51  ;;  %1113 = vst.msk [vmem:[%s2044_s29 + $0x84] sm:$0xf] %vm1079_vm2, %v1427_v52 }
 0x142   : > { %v1509_v53 = vpop.f32.mrb[4].mxu0  ;;  %v1541_v54 = vpop.f32.mrb[4].mxu1 }
 0x143   : > { %v1400_v55 = vpack.c.bf16 %v1509_v53, %v1509_v53  ;;  %v1432_v56 = vpack.c.bf16 %v1541_v54, %v1541_v54  ;;  %v584_v57 = vpop.f32.mrb[5].mxu0  ;;  %v712_v58 = vpop.f32.mrb[5].mxu1 }
 0x144   : > { %v1398_v59 = vpack.c.bf16 %v584_v57, %v584_v57  ;;  %v1430_v60 = vpack.c.bf16 %v712_v58, %v712_v58  ;;  %v1510_v61 = vpop.f32.mrb[6].mxu0  ;;  %v1542_v62 = vpop.f32.mrb[6].mxu1 }
 0x145   : > { %1086 = vst.msk [vmem:[%s2044_s29 + $0x18] sm:$0xf] %vm1079_vm2, %v1400_v55  ;;  %1118 = vst.msk [vmem:[%s2044_s29 + $0x98] sm:$0xf] %vm1079_vm2, %v1432_v56  ;;  %v1401_v63 = vpack.c.bf16 %v1510_v61, %v1510_v61  ;;  %v1433_v0 = vpack.c.bf16 %v1542_v62, %v1542_v62  ;;  %v587_v1 = vpop.f32.mrb[7].mxu0  ;;  %v715_v2 = vpop.f32.mrb[7].mxu1 }
 0x146   : > { %1084 = vst.msk [vmem:[%s2044_s29 + $0x10] sm:$0xf] %vm1079_vm2, %v1398_v59  ;;  %1116 = vst.msk [vmem:[%s2044_s29 + $0x90] sm:$0xf] %vm1079_vm2, %v1430_v60  ;;  %v1399_v3 = vpack.c.bf16 %v587_v1, %v587_v1  ;;  %v1431_v4 = vpack.c.bf16 %v715_v2, %v715_v2 }
 0x147   : > { %1087 = vst.msk [vmem:[%s2044_s29 + $0x1c] sm:$0xf] %vm1079_vm2, %v1401_v63  ;;  %1119 = vst.msk [vmem:[%s2044_s29 + $0x9c] sm:$0xf] %vm1079_vm2, %v1433_v0 }
 0x148   : > { %1085 = vst.msk [vmem:[%s2044_s29 + $0x14] sm:$0xf] %vm1079_vm2, %v1399_v3  ;;  %1117 = vst.msk [vmem:[%s2044_s29 + $0x94] sm:$0xf] %vm1079_vm2, %v1431_v4 }
 0x14a   : > { %v1513_v5 = vpop.f32.mrb[8].mxu0  ;;  %v1545_v6 = vpop.f32.mrb[8].mxu1 }
 0x14b   : > { %v1404_v7 = vpack.c.bf16 %v1513_v5, %v1513_v5  ;;  %v1436_v8 = vpack.c.bf16 %v1545_v6, %v1545_v6  ;;  %v600_v9 = vpop.f32.mrb[9].mxu0  ;;  %v728_v10 = vpop.f32.mrb[9].mxu1 }
 0x14c   : > { %v1402_v11 = vpack.c.bf16 %v600_v9, %v600_v9  ;;  %v1434_v12 = vpack.c.bf16 %v728_v10, %v728_v10  ;;  %v1514_v13 = vpop.f32.mrb[10].mxu0  ;;  %v1546_v14 = vpop.f32.mrb[10].mxu1 }
 0x14d   : > { %1090 = vst.msk [vmem:[%s2044_s29 + $0x28] sm:$0xf] %vm1079_vm2, %v1404_v7  ;;  %1122 = vst.msk [vmem:[%s2044_s29 + $0xa8] sm:$0xf] %vm1079_vm2, %v1436_v8  ;;  %v1405_v15 = vpack.c.bf16 %v1514_v13, %v1514_v13  ;;  %v1437_v16 = vpack.c.bf16 %v1546_v14, %v1546_v14  ;;  %v603_v17 = vpop.f32.mrb[11].mxu0  ;;  %v731_v18 = vpop.f32.mrb[11].mxu1 }
 0x14e   : > { %1088 = vst.msk [vmem:[%s2044_s29 + $0x20] sm:$0xf] %vm1079_vm2, %v1402_v11  ;;  %1120 = vst.msk [vmem:[%s2044_s29 + $0xa0] sm:$0xf] %vm1079_vm2, %v1434_v12  ;;  %v1403_v19 = vpack.c.bf16 %v603_v17, %v603_v17  ;;  %v1435_v20 = vpack.c.bf16 %v731_v18, %v731_v18 }
 0x14f   : > { %1091 = vst.msk [vmem:[%s2044_s29 + $0x2c] sm:$0xf] %vm1079_vm2, %v1405_v15  ;;  %1123 = vst.msk [vmem:[%s2044_s29 + $0xac] sm:$0xf] %vm1079_vm2, %v1437_v16 }
 0x150   : > { %1089 = vst.msk [vmem:[%s2044_s29 + $0x24] sm:$0xf] %vm1079_vm2, %v1403_v19  ;;  %1121 = vst.msk [vmem:[%s2044_s29 + $0xa4] sm:$0xf] %vm1079_vm2, %v1435_v20 }
 0x152   : > { %v1517_v21 = vpop.f32.mrb[12].mxu0  ;;  %v1549_v22 = vpop.f32.mrb[12].mxu1 }
 0x153   : > { %v1408_v23 = vpack.c.bf16 %v1517_v21, %v1517_v21  ;;  %v1440_v24 = vpack.c.bf16 %v1549_v22, %v1549_v22  ;;  %v616_v25 = vpop.f32.mrb[13].mxu0  ;;  %v744_v26 = vpop.f32.mrb[13].mxu1 }
 0x154   : > { %v1406_v27 = vpack.c.bf16 %v616_v25, %v616_v25  ;;  %v1438_v28 = vpack.c.bf16 %v744_v26, %v744_v26  ;;  %v1518_v29 = vpop.f32.mrb[14].mxu0  ;;  %v1550_v30 = vpop.f32.mrb[14].mxu1 }
 0x155   : > { %1094 = vst.msk [vmem:[%s2044_s29 + $0x38] sm:$0xf] %vm1079_vm2, %v1408_v23  ;;  %1126 = vst.msk [vmem:[%s2044_s29 + $0xb8] sm:$0xf] %vm1079_vm2, %v1440_v24  ;;  %v1409_v31 = vpack.c.bf16 %v1518_v29, %v1518_v29  ;;  %v1441_v32 = vpack.c.bf16 %v1550_v30, %v1550_v30  ;;  %v619_v33 = vpop.f32.mrb[15].mxu0  ;;  %v747_v34 = vpop.f32.mrb[15].mxu1 }
 0x156   : > { %1092 = vst.msk [vmem:[%s2044_s29 + $0x30] sm:$0xf] %vm1079_vm2, %v1406_v27  ;;  %1124 = vst.msk [vmem:[%s2044_s29 + $0xb0] sm:$0xf] %vm1079_vm2, %v1438_v28  ;;  %v1407_v35 = vpack.c.bf16 %v619_v33, %v619_v33  ;;  %v1439_v36 = vpack.c.bf16 %v747_v34, %v747_v34 }
 0x157   : > { %1095 = vst.msk [vmem:[%s2044_s29 + $0x3c] sm:$0xf] %vm1079_vm2, %v1409_v31  ;;  %1127 = vst.msk [vmem:[%s2044_s29 + $0xbc] sm:$0xf] %vm1079_vm2, %v1441_v32 }
 0x158   : > { %1093 = vst.msk [vmem:[%s2044_s29 + $0x34] sm:$0xf] %vm1079_vm2, %v1407_v35  ;;  %1125 = vst.msk [vmem:[%s2044_s29 + $0xb4] sm:$0xf] %vm1079_vm2, %v1439_v36 }
 0x15a   : > { %v1521_v37 = vpop.f32.mrb[16].mxu0  ;;  %v1553_v38 = vpop.f32.mrb[16].mxu1 }
 0x15b   : > { %v1412_v39 = vpack.c.bf16 %v1521_v37, %v1521_v37  ;;  %v1444_v40 = vpack.c.bf16 %v1553_v38, %v1553_v38  ;;  %v632_v41 = vpop.f32.mrb[17].mxu0  ;;  %v760_v42 = vpop.f32.mrb[17].mxu1 }
 0x15c   : > { %v1410_v43 = vpack.c.bf16 %v632_v41, %v632_v41  ;;  %v1442_v44 = vpack.c.bf16 %v760_v42, %v760_v42  ;;  %v1522_v45 = vpop.f32.mrb[18].mxu0  ;;  %v1554_v46 = vpop.f32.mrb[18].mxu1 }
 0x15d   : > { %1098 = vst.msk [vmem:[%s2044_s29 + $0x48] sm:$0xf] %vm1079_vm2, %v1412_v39  ;;  %1130 = vst.msk [vmem:[%s2044_s29 + $0xc8] sm:$0xf] %vm1079_vm2, %v1444_v40  ;;  %v1413_v47 = vpack.c.bf16 %v1522_v45, %v1522_v45  ;;  %v1445_v48 = vpack.c.bf16 %v1554_v46, %v1554_v46  ;;  %v635_v49 = vpop.f32.mrb[19].mxu0  ;;  %v763_v50 = vpop.f32.mrb[19].mxu1 }
 0x15e   : > { %1096 = vst.msk [vmem:[%s2044_s29 + $0x40] sm:$0xf] %vm1079_vm2, %v1410_v43  ;;  %1128 = vst.msk [vmem:[%s2044_s29 + $0xc0] sm:$0xf] %vm1079_vm2, %v1442_v44  ;;  %v1411_v51 = vpack.c.bf16 %v635_v49, %v635_v49  ;;  %v1443_v52 = vpack.c.bf16 %v763_v50, %v763_v50 }
 0x15f   : > { %1099 = vst.msk [vmem:[%s2044_s29 + $0x4c] sm:$0xf] %vm1079_vm2, %v1413_v47  ;;  %1131 = vst.msk [vmem:[%s2044_s29 + $0xcc] sm:$0xf] %vm1079_vm2, %v1445_v48 }
 0x160   : > { %1097 = vst.msk [vmem:[%s2044_s29 + $0x44] sm:$0xf] %vm1079_vm2, %v1411_v51  ;;  %1129 = vst.msk [vmem:[%s2044_s29 + $0xc4] sm:$0xf] %vm1079_vm2, %v1443_v52 }
 0x162   : > { %v1525_v53 = vpop.f32.mrb[20].mxu0  ;;  %v1557_v54 = vpop.f32.mrb[20].mxu1 }
 0x163   : > { %v1416_v55 = vpack.c.bf16 %v1525_v53, %v1525_v53  ;;  %v1448_v56 = vpack.c.bf16 %v1557_v54, %v1557_v54  ;;  %v648_v57 = vpop.f32.mrb[21].mxu0  ;;  %v776_v58 = vpop.f32.mrb[21].mxu1 }
 0x164   : > { %v1414_v59 = vpack.c.bf16 %v648_v57, %v648_v57  ;;  %v1446_v60 = vpack.c.bf16 %v776_v58, %v776_v58  ;;  %v1526_v61 = vpop.f32.mrb[22].mxu0  ;;  %v1558_v62 = vpop.f32.mrb[22].mxu1 }
 0x165   : > { %1102 = vst.msk [vmem:[%s2044_s29 + $0x58] sm:$0xf] %vm1079_vm2, %v1416_v55  ;;  %1134 = vst.msk [vmem:[%s2044_s29 + $0xd8] sm:$0xf] %vm1079_vm2, %v1448_v56  ;;  %v1417_v63 = vpack.c.bf16 %v1526_v61, %v1526_v61  ;;  %v1449_v0 = vpack.c.bf16 %v1558_v62, %v1558_v62  ;;  %v651_v1 = vpop.f32.mrb[23].mxu0  ;;  %v779_v2 = vpop.f32.mrb[23].mxu1 }
 0x166   : > { %1100 = vst.msk [vmem:[%s2044_s29 + $0x50] sm:$0xf] %vm1079_vm2, %v1414_v59  ;;  %1132 = vst.msk [vmem:[%s2044_s29 + $0xd0] sm:$0xf] %vm1079_vm2, %v1446_v60  ;;  %v1415_v3 = vpack.c.bf16 %v651_v1, %v651_v1  ;;  %v1447_v4 = vpack.c.bf16 %v779_v2, %v779_v2 }
 0x167   : > { %1103 = vst.msk [vmem:[%s2044_s29 + $0x5c] sm:$0xf] %vm1079_vm2, %v1417_v63  ;;  %1135 = vst.msk [vmem:[%s2044_s29 + $0xdc] sm:$0xf] %vm1079_vm2, %v1449_v0 }
 0x168   : > { %1101 = vst.msk [vmem:[%s2044_s29 + $0x54] sm:$0xf] %vm1079_vm2, %v1415_v3  ;;  %1133 = vst.msk [vmem:[%s2044_s29 + $0xd4] sm:$0xf] %vm1079_vm2, %v1447_v4 }
 0x16a   : > { %v1529_v5 = vpop.f32.mrb[24].mxu0  ;;  %v1561_v6 = vpop.f32.mrb[24].mxu1 }
 0x16b   : > { %v1420_v7 = vpack.c.bf16 %v1529_v5, %v1529_v5  ;;  %v1452_v8 = vpack.c.bf16 %v1561_v6, %v1561_v6  ;;  %v664_v9 = vpop.f32.mrb[25].mxu0  ;;  %v792_v10 = vpop.f32.mrb[25].mxu1 }
 0x16c   : > { %v1418_v11 = vpack.c.bf16 %v664_v9, %v664_v9  ;;  %v1450_v12 = vpack.c.bf16 %v792_v10, %v792_v10  ;;  %v1530_v13 = vpop.f32.mrb[26].mxu0  ;;  %v1562_v14 = vpop.f32.mrb[26].mxu1 }
 0x16d   : > { %1106 = vst.msk [vmem:[%s2044_s29 + $0x68] sm:$0xf] %vm1079_vm2, %v1420_v7  ;;  %1138 = vst.msk [vmem:[%s2044_s29 + $0xe8] sm:$0xf] %vm1079_vm2, %v1452_v8  ;;  %v1421_v15 = vpack.c.bf16 %v1530_v13, %v1530_v13  ;;  %v1453_v16 = vpack.c.bf16 %v1562_v14, %v1562_v14  ;;  %v667_v17 = vpop.f32.mrb[27].mxu0  ;;  %v795_v18 = vpop.f32.mrb[27].mxu1 }
 0x16e   : > { %1104 = vst.msk [vmem:[%s2044_s29 + $0x60] sm:$0xf] %vm1079_vm2, %v1418_v11  ;;  %1136 = vst.msk [vmem:[%s2044_s29 + $0xe0] sm:$0xf] %vm1079_vm2, %v1450_v12  ;;  %v1419_v19 = vpack.c.bf16 %v667_v17, %v667_v17  ;;  %v1451_v20 = vpack.c.bf16 %v795_v18, %v795_v18 }
 0x16f   : > { %1107 = vst.msk [vmem:[%s2044_s29 + $0x6c] sm:$0xf] %vm1079_vm2, %v1421_v15  ;;  %1139 = vst.msk [vmem:[%s2044_s29 + $0xec] sm:$0xf] %vm1079_vm2, %v1453_v16 }
 0x170   : > { %1105 = vst.msk [vmem:[%s2044_s29 + $0x64] sm:$0xf] %vm1079_vm2, %v1419_v19  ;;  %1137 = vst.msk [vmem:[%s2044_s29 + $0xe4] sm:$0xf] %vm1079_vm2, %v1451_v20 }
 0x172   : > { %v1533_v21 = vpop.f32.mrb[28].mxu0  ;;  %v1565_v22 = vpop.f32.mrb[28].mxu1 }
 0x173   : > { %v1424_v23 = vpack.c.bf16 %v1533_v21, %v1533_v21  ;;  %v1456_v24 = vpack.c.bf16 %v1565_v22, %v1565_v22  ;;  %v680_v25 = vpop.f32.mrb[29].mxu0  ;;  %v808_v26 = vpop.f32.mrb[29].mxu1 }
 0x174   : > { %v1422_v27 = vpack.c.bf16 %v680_v25, %v680_v25  ;;  %v1454_v28 = vpack.c.bf16 %v808_v26, %v808_v26  ;;  %v1534_v29 = vpop.f32.mrb[30].mxu0  ;;  %v1566_v30 = vpop.f32.mrb[30].mxu1 }
 0x175   : > { %1110 = vst.msk [vmem:[%s2044_s29 + $0x78] sm:$0xf] %vm1079_vm2, %v1424_v23  ;;  %1142 = vst.msk [vmem:[%s2044_s29 + $0xf8] sm:$0xf] %vm1079_vm2, %v1456_v24  ;;  %v1425_v31 = vpack.c.bf16 %v1534_v29, %v1534_v29  ;;  %v1457_v32 = vpack.c.bf16 %v1566_v30, %v1566_v30  ;;  %v683_v33 = vpop.f32.mrb[31].mxu0  ;;  %v811_v34 = vpop.f32.mrb[31].mxu1 }
 0x176   : > { %1108 = vst.msk [vmem:[%s2044_s29 + $0x70] sm:$0xf] %vm1079_vm2, %v1422_v27  ;;  %1140 = vst.msk [vmem:[%s2044_s29 + $0xf0] sm:$0xf] %vm1079_vm2, %v1454_v28  ;;  %v1423_v35 = vpack.c.bf16 %v683_v33, %v683_v33  ;;  %v1455_v36 = vpack.c.bf16 %v811_v34, %v811_v34 }
 0x177   : > { %1111 = vst.msk [vmem:[%s2044_s29 + $0x7c] sm:$0xf] %vm1079_vm2, %v1425_v31  ;;  %1143 = vst.msk [vmem:[%s2044_s29 + $0xfc] sm:$0xf] %vm1079_vm2, %v1457_v32 }
 0x178   : > { %1109 = vst.msk [vmem:[%s2044_s29 + $0x74] sm:$0xf] %vm1079_vm2, %v1423_v35  ;;  %1141 = vst.msk [vmem:[%s2044_s29 + $0xf4] sm:$0xf] %vm1079_vm2, %v1455_v36 }
 0x179   : > { %1760 = shalt.err (!%p1757_p3)
}
 0x17a   : > { %s1761_s18 = scalar_lea.hbm %s2168_s5, 4096  ;;  %s1765_s27 = scalar_lea.hbm %s2234_s2, 8192 }
 0x17b   : > { %p1762_p6 = scmp.ne.s32.totalorder %s2168_s5, %s1761_s18  ;;  %p1766_p2 = scmp.lt.u32.totalorder %s2168_s5, %s2234_s2 }
 0x17c   : > { %p1767_p4 = scmp.lt.u32.totalorder %s1765_s27, %s1761_s18  ;;  %p1769_p8 = scmp.lt.u32.totalorder %s1761_s18, %s2168_s5 }
 0x17d   : > { %p1763_p10 = pnand %p1762_p6, %p2253_p12 }
 0x17e   : > { %p1768_p9 = por %p1767_p4, %p1766_p2 }
 0x17f   : > { %p1764_p11 = pneg %p1763_p10 }
 0x180   : > { %p1770_p1 = por %p1769_p8, %p1768_p9 }
 0x182   : > { %p1771_p5 = pnand %p1770_p1, %p1764_p11 }
 0x184   : > { %1774 = shalt.err (!%p1771_p5)
}
 0x185   : > { %s1840_s4 = smov 64   ;;  %s1841_s19 = smov 4  }
 0x186   : > { %1583 = dma.vmem_to_hbm [thread:$0]  (%p2253_p12), %s2170_s6, 4096, %s2168_s5, %s2186_s12, %s1840_s4, %s1840_s4, %s1841_s19  }
 0x187 PF: > { %p1598_p0 = scmp.ge.s32.totalorder %s1833_s14, 2  ;;  %s1175_s20 = sand.u32 1, %s1813_s9  }
 0x188   : > { %p2254_p7 = scmp.ne.s32.totalorder %s2245_s23, 0  ;;  %s1176_s29 = scalar_lea.sflag [#allocation4], %s1175_s20 }
 0x18a   : > { %p1593_p13 = pnand %p1598_p0, %p2254_p7 }
 0x18c   : > { %1808 = dma.done.wait (!%p1593_p13), %s1176_s29, 4096  }
 0x18d   : > { %1810 = vsyncadd (!%p1593_p13), %s1176_s29, 4294963200  ;;  %s17_s14 = sadd.s32 1, %s1833_s14   ;;  %s2255_s9 = smov %s1817_s10 }
 0x18e   : > { %p14_p3 = scmp.ge.s32.totalorder %s17_s14, 4   ;;  %s2256_s10 = smov %s1821_s11 }
 0x18f   : > { %s2257_s11 = smov %s1919_s24  ;;  %s2258_s12 = smov %s1829_s13 }
 0x190   : > { %s2259_s13 = smov %s2261_s17  ;;  %16 = sbr.rel (!%p14_p3) target bundleno = 6 (0x6), region = 71 }
 0x197   :  { %1181 = vsyncpa [#allocation3], 1 }
 0x198   :  { %1183 = vsyncpa [#allocation3 + $0x1], 1 }
 0x199   :  { %1184 = vsyncpa [#allocation6], 1 }
 0x19a   :  { %1185 = vsyncpa [#allocation4], 1 }
 0x19b   :  { %1187 = vsyncpa [#allocation4 + $0x1], 1 }

// kernel: tpu_custom_call.1
= control target key start
LH: loop header
LB: loop body
LE: loop exit
PB: predicated region body
PF: predicated region fallthrough
CT: control target
= control target key end

     0   :  { %7 = vsyncpa [#allocation3], 0  ;;  %s2313_s0 = inlined_call_operand.hbm [shape: bf16[2,1,512,54], index: 0, kind: input, shape index: {}]   ;;  %s2314_s1 = inlined_call_operand.hbm [shape: bf16[1,54,32], index: 1, kind: input, shape index: {}]   ;;  %s2315_s2 = inlined_call_operand.hbm [shape: bf16[2,512,32], index: 2, kind: output, shape index: {}]  }
   0x1   :  { %9 = vsyncpa [#allocation3 + $0x1], 0 }
   0x2   :  { %10 = vsyncpa [#allocation6], 0 }
   0x3   :  { %11 = vsyncpa [#allocation4], 0 }
   0x4   :  { %13 = vsyncpa [#allocation4 + $0x1], 0  ;;  %s1887_s9 = smov 0   ;;  %s1889_s10 = smov 0  }
   0x5   :  { %s1891_s11 = smov 0   ;;  %s1893_s12 = smov 0  }
   0x6   :  { %s1895_s13 = smov 0   ;;  %s1897_s14 = smov 0  }
   0x7 LB: > { %s1273_s15 = sadd.s32 4294967295, %s1863_s14   ;;  %s1274_s16 = sadd.s32 4294967294, %s1863_s14   ;;  %s1863_s14 = sphi %s1897_s14, %s19_s14   ;;  %s1859_s13 = sphi %s1895_s13, %s2339_s13   ;;  %s1855_s12 = sphi %s1893_s12, %s2338_s12   ;;  %s1851_s11 = sphi %s1891_s11, %s2337_s11   ;;  %s1847_s10 = sphi %s1889_s10, %s2336_s10   ;;  %s1843_s9 = sphi %s1887_s9, %s2335_s9  }
   0x8   : > { %p51_p0 = scmp.ne.s32.totalorder %s1847_s10, %s1843_s9  ;;  %p1921_p1 = scmp.eq.s32.totalorder %s1273_s15, 0 }
   0x9   : > { %p1925_p2 = scmp.eq.s32.totalorder %s1273_s15, 1  ;;  %p104_p3 = scmp.eq.s32.totalorder %s1274_s16, 1 }
   0xa   : > { %s2320_s17 = scalar_select %p1921_p1, 1, 0 }
   0xb   : > { %s2321_s18 = scalar_select %p1925_p2, 1, 0 }
   0xc   : > { %p1931_p4 = por %p1921_p1, %p51_p0  ;;  %p1275_p5 = scmp.ge.s32.totalorder %s1863_s14, 1 }
   0xd   : > { %p1936_p6 = por %p104_p3, %p51_p0  ;;  %p111_p7 = scmp.lt.s32.totalorder %s1863_s14, 3 }
   0xe   : > { %s2322_s19 = scalar_select %p1931_p4, 1, 0 }
   0xf   : > { %s2323_s20 = scalar_select %p1936_p6, 1, 0 }
  0x10   : > { %p1941_p8 = pnand %p1275_p5, %p111_p7  ;;  %s1865_s22 = smov [#allocation5]  }
  0x11   : > { %s123_s23 = sshll.u32 %s1865_s22, 4  ;;  %s31_s25 = sadd.s32 1, %s1859_s13  ;;  %s124_s23 = int_to_ptr.vmem [resolvable:$true] %s123_s23 }
  0x12   : > { %s2324_s21 = scalar_select %p1941_p8, 1, 0 }
  0x13   : > { %p1614_p9 = pneg %p1941_p8  ;;  %s1719_s28 = scalar_lea.hbm %s2314_s1, 448 }
  0x14   : > { %p1720_p12 = scmp.ne.s32.totalorder %s2314_s1, %s1719_s28  ;;  %p1726_p5 = scmp.lt.u32.totalorder %s1719_s28, %s2314_s1 }
  0x15   : > { %p1950_p11 = pnand %p1614_p9, %p1921_p1 }
  0x17   : > { %p1721_p13 = pneg %p1950_p11 }
  0x19   : > { %p1722_p0 = pnand %p1721_p13, %p1720_p12 }
  0x1b   : > { %p1723_p3 = pneg %p1722_p0 }
  0x1d   : > { %p1728_p7 = pnand %p1726_p5, %p1723_p3 }
  0x1f   : > { %1731 = shalt.err (!%p1728_p7)
}
  0x20   : > { %s1732_s5 = scalar_lea.vmem %s124_s23, 448  ;;  %p1740_p1 = scmp.lt.s32.totalorder %s124_s23, %s124_s23 }
  0x21   : > { %p1733_p9 = scmp.ne.s32.totalorder %s124_s23, %s1732_s5  ;;  %p1741_p4 = scmp.lt.s32.totalorder %s1732_s5, %s1732_s5 }
  0x23   : > { %p1735_p10 = pnand %p1733_p9, %p1721_p13  ;;  %p1742_p8 = por %p1741_p4, %p1740_p1 }
  0x25   : > { %p1736_p6 = pneg %p1735_p10 }
  0x27   : > { %p1743_p2 = pnand %p1742_p8, %p1736_p6 }
  0x29   : > { %1746 = shalt.err (!%p1743_p2)
}
  0x2a   : > { %s1866_s6 = smov 64   ;;  %s1867_s7 = smov 4  }
  0x2b   : > { %1617 = dma.hbm_to_vmem [thread:$0]  (!%p1950_p11), %s2314_s1, 448, %s124_s23, [#allocation6], %s1866_s6, %s1866_s6, %s1867_s7  }
  0x2c   : > { %p33_p1 = scmp.ge.s32.totalorder %s31_s25, 2  ;;  %s38_s16 = sadd.s32 1, %s1851_s11 }
  0x2d   : > { %p45_p2 = scmp.ne.s32.totalorder %s1851_s11, %s1847_s10  ;;  %p46_p4 = scmp.eq.s32.totalorder %s1863_s14, 0 }
  0x2e   : > { %s2341_s25 = smov (%p33_p1, %s31_s25), 0  ;;  %p2327_p8 = scmp.ne.s32.totalorder %s2321_s18, 0 }
  0x2f   : > { %p1980_p6 = por %p46_p4, %p45_p2  ;;  %s35_s26 = ssub.s32 %s1859_s13, %s2341_s25 }
  0x30   : > { %p1986_p10 = por %p2327_p8, %p45_p2  ;;  %p1627_p12 = scmp.lt.s32.totalorder %s1863_s14, 2 }
  0x31   : > { %p36_p11 = scmp.eq.s32.totalorder %s35_s26, 0  ;;  %s137_s23 = sand.u32 1, %s1851_s11  }
  0x32   : > { %s1278_s27 = sshll.u32 %s137_s23, 8  ;;  %s1422_s29 = sshll.u32 %s1859_s13, 12 }
  0x33   : > { %s1995_s28 = scalar_select %p36_p11, %s1851_s11, %s38_s16  }
  0x34   : > { %s2001_s4 = scalar_lea.hbm %s2313_s0, %s1422_s29  ;;  %s141_s18 = scalar_lea.vmem [#allocation2], %s1278_s27 }
  0x35   : > { %s148_s5 = sshll.u32 %s141_s18, 4  ;;  %p2007_p13 = pnand %p1627_p12, %p1980_p6  ;;  %s2003_s5 = int_to_ptr.vmem [resolvable:$true] %s148_s5 }
  0x36   : > { %s2011_s15 = scalar_lea.sflag [#allocation3], %s137_s23  ;;  %s1747_s16 = scalar_lea.hbm %s2001_s4, 4096 }
  0x37   : > { %p1748_p0 = scmp.ne.s32.totalorder %s2001_s4, %s1747_s16  ;;  %p1749_p3 = pneg %p2007_p13 }
  0x38   : > { %s1752_s22 = scalar_lea.hbm %s2313_s0, 8192  ;;  %p1753_p9 = scmp.lt.u32.totalorder %s2001_s4, %s2313_s0 }
  0x39   : > { %p1750_p5 = pnand %p1749_p3, %p1748_p0  ;;  %p1754_p1 = scmp.lt.u32.totalorder %s1752_s22, %s1747_s16 }
  0x3a   : > { %p1756_p4 = scmp.lt.u32.totalorder %s1747_s16, %s2001_s4 }
  0x3b   : > { %p1751_p7 = pneg %p1750_p5  ;;  %p1755_p2 = por %p1754_p1, %p1753_p9 }
  0x3d   : > { %p1757_p6 = por %p1756_p4, %p1755_p2 }
  0x3f   : > { %p1758_p8 = pnand %p1757_p6, %p1751_p7 }
  0x41   : > { %1761 = shalt.err (!%p1758_p8)
}
  0x42   : > { %s1762_s23 = scalar_lea.vmem %s2003_s5, 4096  ;;  %s1868_s3 = smov [#allocation2]  }
  0x43   : > { %p1763_p12 = scmp.ne.s32.totalorder %s2003_s5, %s1762_s23  ;;  %s1767_s18 = sshll.u32 %s1868_s3, 4  ;;  %s1768_s18 = int_to_ptr.vmem [resolvable:$false] %s1767_s18 }
  0x44   : > { %s1769_s26 = scalar_lea.vmem %s1768_s18, 8192  ;;  %p1770_p5 = scmp.lt.s32.totalorder %s2003_s5, %s1768_s18 }
  0x45   : > { %p1765_p11 = pnand %p1763_p12, %p1749_p3  ;;  %p1771_p9 = scmp.lt.s32.totalorder %s1769_s26, %s1762_s23 }
  0x47   : > { %p1766_p0 = pneg %p1765_p11  ;;  %p1772_p1 = por %p1771_p9, %p1770_p5 }
  0x49   : > { %p1773_p2 = pnand %p1772_p1, %p1766_p0 }
  0x4b   : > { %1776 = shalt.err (!%p1773_p2)
}
  0x4c   : > { %1621 = dma.hbm_to_vmem [thread:$0]  (!%p2007_p13), %s2001_s4, 4096, %s2003_s5, %s2011_s15, %s1866_s6, %s1866_s6, %s1867_s7  }
  0x4d   : > { %p2330_p3 = scmp.ne.s32.totalorder %s2324_s21, 0 }
  0x4e   : > { %s2045_s16 = sand.u32 (!%p2330_p3), 1, %s1847_s10   ;;  %p2331_p7 = scmp.ne.s32.totalorder (!%p2330_p3), %s2322_s19, 0 }
  0x4f   : > { %160 = sbr.rel (%p2330_p3) target bundleno = 395 (0x18b), region = 28  ;;  %s1282_s27 = sshll.u32 (!%p2330_p3), %s2045_s16, 8 }
  0x50   : > { %s163_s22 = scalar_lea.sflag (!%p2330_p3), [#allocation3], %s2045_s16  ;;  %s2051_s8 = scalar_lea.vmem (!%p2330_p3), [#allocation2], %s1282_s27 }
  0x56   : > { %1830 = dma.done.wait (%p2331_p7), %s163_s22, 4096  }
  0x57   : > { %1832 = vsyncadd (%p2331_p7), %s163_s22, 4294963200  ;;  %p2332_p13 = scmp.ne.s32.totalorder %s2320_s17, 0 }
  0x59   : > { %1834 = dma.done.wait (%p2332_p13), [#allocation6], 448  }
  0x5a   : > { %1836 = vsyncadd (%p2332_p13), [#allocation6], 4294966848  ;;  %v1683_v0 = vld [vmem:[#allocation5] sm:$0xff]   ;;  %v1684_v1 = vld [vmem:[#allocation5 + $0x8] sm:$0xff]   ;;  %vm450_vm0 = vcmask 441344   ;;  %vm547_vm1 = vcmask 1042432  }
  0x5b   : > { %1524 = vmatprep.subr.bf16.mxu0 %v1683_v0  ;;  %1596 = vmatprep.subr.bf16.mxu1 %v1683_v0  ;;  %v1685_v2 = vld [vmem:[#allocation5 + $0x10] sm:$0xff]   ;;  %v1687_v3 = vld [vmem:[%s2051_s8] sm:$0xff]   ;;  %v1686_v5 = vld [vmem:[#allocation5 + $0x18] ss:$0 sps:$4 sm:$0x77]   ;;  %vm1096_vm2 = vcmask 257024  }
  0x5c   : > { %1525 = vmatpush3.bf16.msra.mxu0 %v1683_v0  ;;  %1600 = vmatpush3.bf16.msra.mxu1 %v1683_v0  ;;  %v1688_v4 = vld [vmem:[%s2051_s8 + $0x80] sm:$0xff]   ;;  %v549_v6 = vsel %vm547_vm1, %v1686_v5, 0  ;;  %v1689_v7 = vld [vmem:[%s2051_s8 + $0x8] sm:$0xff]   ;;  %v1691_v9 = vld [vmem:[%s2051_s8 + $0x10] sm:$0xff]   ;;  %s2127_s17 = scalar_lea.vmem [#allocation7], %s1282_s27  ;;  %s1487_s19 = sshll.u32 %s1855_s12, 12 }
  0x5d   : > { %1526 = vmatprep.subr.bf16.mxu0 %v1684_v1  ;;  %1597 = vmatprep.subr.bf16.mxu1 %v1684_v1  ;;  %v1690_v8 = vld [vmem:[%s2051_s8 + $0x88] sm:$0xff]   ;;  %v1692_v10 = vld [vmem:[%s2051_s8 + $0x90] sm:$0xff]   ;;  %v1693_v11 = vld [vmem:[%s2051_s8 + $0x18] sm:$0xff]   ;;  %s1177_s21 = sshll.u32 %s2127_s17, 4  ;;  %s2250_s7 = scalar_lea.hbm %s2315_s2, %s1487_s19  ;;  %s2252_s21 = int_to_ptr.vmem [resolvable:$true] %s1177_s21 }
  0x5e   : > { %1532 = vmatprep.mubr.msk.bf16.mxu0 %vm450_vm0, %v1687_v3  ;;  %1564 = vmatprep.mubr.msk.bf16.mxu1 %vm450_vm0, %v1688_v4  ;;  %v1694_v12 = vld [vmem:[%s2051_s8 + $0x98] sm:$0xff]   ;;  %v1695_v13 = vld [vmem:[%s2051_s8 + $0x20] sm:$0xff]   ;;  %v1697_v15 = vld [vmem:[%s2051_s8 + $0x28] sm:$0xff]   ;;  %s1162_s4 = scalar_lea.sflag [#allocation4], %s2045_s16  ;;  %s1777_s5 = scalar_lea.vmem %s2252_s21, 4096 }
  0x5f   : > { %v1696_v14 = vld [vmem:[%s2051_s8 + $0xa0] sm:$0xff]   ;;  %v1698_v16 = vld [vmem:[%s2051_s8 + $0xa8] sm:$0xff]   ;;  %v1699_v17 = vld [vmem:[%s2051_s8 + $0x30] sm:$0xff]   ;;  %p1778_p4 = scmp.ne.s32.totalorder %s2252_s21, %s1777_s5  ;;  %s1869_s15 = smov [#allocation7]  }
  0x60   : > { %1527 = vmatpush3.bf16.msra.mxu0 %v1684_v1  ;;  %1601 = vmatpush3.bf16.msra.mxu1 %v1684_v1  ;;  %v1700_v18 = vld [vmem:[%s2051_s8 + $0xb0] sm:$0xff]   ;;  %v1701_v19 = vld [vmem:[%s2051_s8 + $0x38] sm:$0xff]   ;;  %v1703_v21 = vld [vmem:[%s2051_s8 + $0x40] sm:$0xff]   ;;  %s1781_s29 = sshll.u32 %s1869_s15, 4  ;;  %s1782_s29 = int_to_ptr.vmem [resolvable:$false] %s1781_s29 }
  0x61   : > { %1528 = vmatprep.subr.bf16.mxu0 %v1685_v2  ;;  %1598 = vmatprep.subr.bf16.mxu1 %v1685_v2  ;;  %v1702_v20 = vld [vmem:[%s2051_s8 + $0xb8] sm:$0xff]   ;;  %v1704_v22 = vld [vmem:[%s2051_s8 + $0xc0] sm:$0xff]   ;;  %v1705_v23 = vld [vmem:[%s2051_s8 + $0x48] sm:$0xff]   ;;  %p1779_p6 = pnand %p1778_p4, %p1986_p10  ;;  %s1783_s30 = scalar_lea.vmem %s1782_s29, 8192 }
  0x62   : > { %v1706_v24 = vld [vmem:[%s2051_s8 + $0xc8] sm:$0xff]   ;;  %v1707_v25 = vld [vmem:[%s2051_s8 + $0x50] sm:$0xff]   ;;  %v1709_v27 = vld [vmem:[%s2051_s8 + $0x58] sm:$0xff]   ;;  %p1784_p12 = scmp.lt.s32.totalorder %s2252_s21, %s1782_s29  ;;  %p1785_p11 = scmp.lt.s32.totalorder %s1783_s30, %s1777_s5 }
  0x63   : > { %v1708_v26 = vld [vmem:[%s2051_s8 + $0xd0] sm:$0xff]   ;;  %v1710_v28 = vld [vmem:[%s2051_s8 + $0xd8] sm:$0xff]   ;;  %v1711_v29 = vld [vmem:[%s2051_s8 + $0x60] sm:$0xff]   ;;  %p1780_p8 = pneg %p1779_p6 }
  0x64   : > { %1529 = vmatpush3.bf16.msra.mxu0 %v1685_v2  ;;  %1602 = vmatpush3.bf16.msra.mxu1 %v1685_v2  ;;  %v1712_v30 = vld [vmem:[%s2051_s8 + $0xe0] sm:$0xff]   ;;  %v1713_v31 = vld [vmem:[%s2051_s8 + $0x68] sm:$0xff]   ;;  %v1715_v33 = vld [vmem:[%s2051_s8 + $0x70] sm:$0xff]   ;;  %p1786_p0 = por %p1785_p11, %p1784_p12 }
  0x65   : > { %1604 = vmatprep.subr.msk.bf16.mxu0 %vm547_vm1, %v1686_v5  ;;  %1605 = vmatprep.subr.msk.bf16.mxu1 %vm547_vm1, %v1686_v5  ;;  %v1714_v32 = vld [vmem:[%s2051_s8 + $0xe8] sm:$0xff]   ;;  %v1716_v34 = vld [vmem:[%s2051_s8 + $0xf0] sm:$0xff]   ;;  %v1717_v35 = vld [vmem:[%s2051_s8 + $0x78] sm:$0xff]  }
  0x66   : > { %v1718_v36 = vld [vmem:[%s2051_s8 + $0xf8] sm:$0xff]   ;;  %p1787_p5 = pnand %p1786_p0, %p1780_p8 }
  0x68   : > { %1531 = vmatpush3.bf16.msra.mxu0 %v549_v6  ;;  %1603 = vmatpush3.bf16.msra.mxu1 %v549_v6 }
  0x6b   : > { %1533 = vmatmul.mubr.msk.bf16.vlgmr.msra.gmra.mrb[0].mxu0 %vm450_vm0, %v1689_v7  ;;  %1565 = vmatmul.mubr.msk.bf16.vlgmr.msra.gmra.mrb[0].mxu1 %vm450_vm0, %v1690_v8 }
  0x6c   : > { %1536 = vmatprep.mubr.msk.bf16.mxu0 %vm450_vm0, %v1691_v9  ;;  %1568 = vmatprep.mubr.msk.bf16.mxu1 %vm450_vm0, %v1692_v10 }
  0x73   : > { %1537 = vmatmul.mubr.msk.bf16.gmra.mrb[4].mxu0 %vm450_vm0, %v1693_v11  ;;  %1569 = vmatmul.mubr.msk.bf16.gmra.mrb[4].mxu1 %vm450_vm0, %v1694_v12 }
  0x74   : > { %1540 = vmatprep.mubr.msk.bf16.mxu0 %vm450_vm0, %v1695_v13  ;;  %1572 = vmatprep.mubr.msk.bf16.mxu1 %vm450_vm0, %v1696_v14 }
  0x7b   : > { %1541 = vmatmul.mubr.msk.bf16.gmra.mrb[8].mxu0 %vm450_vm0, %v1697_v15  ;;  %1573 = vmatmul.mubr.msk.bf16.gmra.mrb[8].mxu1 %vm450_vm0, %v1698_v16 }
  0x7c   : > { %1544 = vmatprep.mubr.msk.bf16.mxu0 %vm450_vm0, %v1699_v17  ;;  %1576 = vmatprep.mubr.msk.bf16.mxu1 %vm450_vm0, %v1700_v18 }
  0x83   : > { %1545 = vmatmul.mubr.msk.bf16.gmra.mrb[12].mxu0 %vm450_vm0, %v1701_v19  ;;  %1577 = vmatmul.mubr.msk.bf16.gmra.mrb[12].mxu1 %vm450_vm0, %v1702_v20 }
  0x84   : > { %1548 = vmatprep.mubr.msk.bf16.mxu0 %vm450_vm0, %v1703_v21  ;;  %1580 = vmatprep.mubr.msk.bf16.mxu1 %vm450_vm0, %v1704_v22 }
  0x8b   : > { %1549 = vmatmul.mubr.msk.bf16.gmra.mrb[16].mxu0 %vm450_vm0, %v1705_v23  ;;  %1581 = vmatmul.mubr.msk.bf16.gmra.mrb[16].mxu1 %vm450_vm0, %v1706_v24 }
  0x8c   : > { %1552 = vmatprep.mubr.msk.bf16.mxu0 %vm450_vm0, %v1707_v25  ;;  %1584 = vmatprep.mubr.msk.bf16.mxu1 %vm450_vm0, %v1708_v26 }
  0x93   : > { %1553 = vmatmul.mubr.msk.bf16.gmra.mrb[20].mxu0 %vm450_vm0, %v1709_v27  ;;  %1585 = vmatmul.mubr.msk.bf16.gmra.mrb[20].mxu1 %vm450_vm0, %v1710_v28 }
  0x94   : > { %1556 = vmatprep.mubr.msk.bf16.mxu0 %vm450_vm0, %v1711_v29  ;;  %1588 = vmatprep.mubr.msk.bf16.mxu1 %vm450_vm0, %v1712_v30 }
  0x9b   : > { %1557 = vmatmul.mubr.msk.bf16.gmra.mrb[24].mxu0 %vm450_vm0, %v1713_v31  ;;  %1589 = vmatmul.mubr.msk.bf16.gmra.mrb[24].mxu1 %vm450_vm0, %v1714_v32 }
  0x9c   : > { %1560 = vmatprep.mubr.msk.bf16.mxu0 %vm450_vm0, %v1715_v33  ;;  %1592 = vmatprep.mubr.msk.bf16.mxu1 %vm450_vm0, %v1716_v34 }
  0xa3   : > { %1561 = vmatmul.mubr.msk.bf16.gmra.mrb[28].mxu0 %vm450_vm0, %v1717_v35  ;;  %1593 = vmatmul.mubr.msk.bf16.gmra.mrb[28].mxu1 %vm450_vm0, %v1718_v36 }
 0x13e   : > { %v1534_v37 = vpop.f32.mrb[0].mxu0  ;;  %v1566_v38 = vpop.f32.mrb[0].mxu1 }
 0x13f   : > { %v1425_v39 = vpack.c.bf16 %v1534_v37, %v1534_v37  ;;  %v1457_v40 = vpack.c.bf16 %v1566_v38, %v1566_v38  ;;  %v585_v41 = vpop.f32.mrb[1].mxu0  ;;  %v713_v42 = vpop.f32.mrb[1].mxu1 }
 0x140   : > { %v1423_v43 = vpack.c.bf16 %v585_v41, %v585_v41  ;;  %v1455_v44 = vpack.c.bf16 %v713_v42, %v713_v42  ;;  %v1535_v45 = vpop.f32.mrb[2].mxu0  ;;  %v1567_v46 = vpop.f32.mrb[2].mxu1 }
 0x141   : > { %1099 = vst.msk [vmem:[%s2127_s17 + $0x8] sm:$0xf] %vm1096_vm2, %v1425_v39  ;;  %1131 = vst.msk [vmem:[%s2127_s17 + $0x88] sm:$0xf] %vm1096_vm2, %v1457_v40  ;;  %v1426_v47 = vpack.c.bf16 %v1535_v45, %v1535_v45  ;;  %v1458_v48 = vpack.c.bf16 %v1567_v46, %v1567_v46  ;;  %v588_v49 = vpop.f32.mrb[3].mxu0  ;;  %v716_v50 = vpop.f32.mrb[3].mxu1 }
 0x142   : > { %1097 = vst.msk [vmem:[%s2127_s17] sm:$0xf] %vm1096_vm2, %v1423_v43  ;;  %1129 = vst.msk [vmem:[%s2127_s17 + $0x80] sm:$0xf] %vm1096_vm2, %v1455_v44  ;;  %v1424_v51 = vpack.c.bf16 %v588_v49, %v588_v49  ;;  %v1456_v52 = vpack.c.bf16 %v716_v50, %v716_v50 }
 0x143   : > { %1100 = vst.msk [vmem:[%s2127_s17 + $0xc] sm:$0xf] %vm1096_vm2, %v1426_v47  ;;  %1132 = vst.msk [vmem:[%s2127_s17 + $0x8c] sm:$0xf] %vm1096_vm2, %v1458_v48 }
 0x144   : > { %1098 = vst.msk [vmem:[%s2127_s17 + $0x4] sm:$0xf] %vm1096_vm2, %v1424_v51  ;;  %1130 = vst.msk [vmem:[%s2127_s17 + $0x84] sm:$0xf] %vm1096_vm2, %v1456_v52 }
 0x146   : > { %v1538_v53 = vpop.f32.mrb[4].mxu0  ;;  %v1570_v54 = vpop.f32.mrb[4].mxu1 }
 0x147   : > { %v1429_v55 = vpack.c.bf16 %v1538_v53, %v1538_v53  ;;  %v1461_v56 = vpack.c.bf16 %v1570_v54, %v1570_v54  ;;  %v601_v57 = vpop.f32.mrb[5].mxu0  ;;  %v729_v58 = vpop.f32.mrb[5].mxu1 }
 0x148   : > { %v1427_v59 = vpack.c.bf16 %v601_v57, %v601_v57  ;;  %v1459_v60 = vpack.c.bf16 %v729_v58, %v729_v58  ;;  %v1539_v61 = vpop.f32.mrb[6].mxu0  ;;  %v1571_v62 = vpop.f32.mrb[6].mxu1 }
 0x149   : > { %1103 = vst.msk [vmem:[%s2127_s17 + $0x18] sm:$0xf] %vm1096_vm2, %v1429_v55  ;;  %1135 = vst.msk [vmem:[%s2127_s17 + $0x98] sm:$0xf] %vm1096_vm2, %v1461_v56  ;;  %v1430_v63 = vpack.c.bf16 %v1539_v61, %v1539_v61  ;;  %v1462_v0 = vpack.c.bf16 %v1571_v62, %v1571_v62  ;;  %v604_v1 = vpop.f32.mrb[7].mxu0  ;;  %v732_v2 = vpop.f32.mrb[7].mxu1 }
 0x14a   : > { %1101 = vst.msk [vmem:[%s2127_s17 + $0x10] sm:$0xf] %vm1096_vm2, %v1427_v59  ;;  %1133 = vst.msk [vmem:[%s2127_s17 + $0x90] sm:$0xf] %vm1096_vm2, %v1459_v60  ;;  %v1428_v3 = vpack.c.bf16 %v604_v1, %v604_v1  ;;  %v1460_v4 = vpack.c.bf16 %v732_v2, %v732_v2 }
 0x14b   : > { %1104 = vst.msk [vmem:[%s2127_s17 + $0x1c] sm:$0xf] %vm1096_vm2, %v1430_v63  ;;  %1136 = vst.msk [vmem:[%s2127_s17 + $0x9c] sm:$0xf] %vm1096_vm2, %v1462_v0 }
 0x14c   : > { %1102 = vst.msk [vmem:[%s2127_s17 + $0x14] sm:$0xf] %vm1096_vm2, %v1428_v3  ;;  %1134 = vst.msk [vmem:[%s2127_s17 + $0x94] sm:$0xf] %vm1096_vm2, %v1460_v4 }
 0x14e   : > { %v1542_v5 = vpop.f32.mrb[8].mxu0  ;;  %v1574_v6 = vpop.f32.mrb[8].mxu1 }
 0x14f   : > { %v1433_v7 = vpack.c.bf16 %v1542_v5, %v1542_v5  ;;  %v1465_v8 = vpack.c.bf16 %v1574_v6, %v1574_v6  ;;  %v617_v9 = vpop.f32.mrb[9].mxu0  ;;  %v745_v10 = vpop.f32.mrb[9].mxu1 }
 0x150   : > { %v1431_v11 = vpack.c.bf16 %v617_v9, %v617_v9  ;;  %v1463_v12 = vpack.c.bf16 %v745_v10, %v745_v10  ;;  %v1543_v13 = vpop.f32.mrb[10].mxu0  ;;  %v1575_v14 = vpop.f32.mrb[10].mxu1 }
 0x151   : > { %1107 = vst.msk [vmem:[%s2127_s17 + $0x28] sm:$0xf] %vm1096_vm2, %v1433_v7  ;;  %1139 = vst.msk [vmem:[%s2127_s17 + $0xa8] sm:$0xf] %vm1096_vm2, %v1465_v8  ;;  %v1434_v15 = vpack.c.bf16 %v1543_v13, %v1543_v13  ;;  %v1466_v16 = vpack.c.bf16 %v1575_v14, %v1575_v14  ;;  %v620_v17 = vpop.f32.mrb[11].mxu0  ;;  %v748_v18 = vpop.f32.mrb[11].mxu1 }
 0x152   : > { %1105 = vst.msk [vmem:[%s2127_s17 + $0x20] sm:$0xf] %vm1096_vm2, %v1431_v11  ;;  %1137 = vst.msk [vmem:[%s2127_s17 + $0xa0] sm:$0xf] %vm1096_vm2, %v1463_v12  ;;  %v1432_v19 = vpack.c.bf16 %v620_v17, %v620_v17  ;;  %v1464_v20 = vpack.c.bf16 %v748_v18, %v748_v18 }
 0x153   : > { %1108 = vst.msk [vmem:[%s2127_s17 + $0x2c] sm:$0xf] %vm1096_vm2, %v1434_v15  ;;  %1140 = vst.msk [vmem:[%s2127_s17 + $0xac] sm:$0xf] %vm1096_vm2, %v1466_v16 }
 0x154   : > { %1106 = vst.msk [vmem:[%s2127_s17 + $0x24] sm:$0xf] %vm1096_vm2, %v1432_v19  ;;  %1138 = vst.msk [vmem:[%s2127_s17 + $0xa4] sm:$0xf] %vm1096_vm2, %v1464_v20 }
 0x156   : > { %v1546_v21 = vpop.f32.mrb[12].mxu0  ;;  %v1578_v22 = vpop.f32.mrb[12].mxu1 }
 0x157   : > { %v1437_v23 = vpack.c.bf16 %v1546_v21, %v1546_v21  ;;  %v1469_v24 = vpack.c.bf16 %v1578_v22, %v1578_v22  ;;  %v633_v25 = vpop.f32.mrb[13].mxu0  ;;  %v761_v26 = vpop.f32.mrb[13].mxu1 }
 0x158   : > { %v1435_v27 = vpack.c.bf16 %v633_v25, %v633_v25  ;;  %v1467_v28 = vpack.c.bf16 %v761_v26, %v761_v26  ;;  %v1547_v29 = vpop.f32.mrb[14].mxu0  ;;  %v1579_v30 = vpop.f32.mrb[14].mxu1 }
 0x159   : > { %1111 = vst.msk [vmem:[%s2127_s17 + $0x38] sm:$0xf] %vm1096_vm2, %v1437_v23  ;;  %1143 = vst.msk [vmem:[%s2127_s17 + $0xb8] sm:$0xf] %vm1096_vm2, %v1469_v24  ;;  %v1438_v31 = vpack.c.bf16 %v1547_v29, %v1547_v29  ;;  %v1470_v32 = vpack.c.bf16 %v1579_v30, %v1579_v30  ;;  %v636_v33 = vpop.f32.mrb[15].mxu0  ;;  %v764_v34 = vpop.f32.mrb[15].mxu1 }
 0x15a   : > { %1109 = vst.msk [vmem:[%s2127_s17 + $0x30] sm:$0xf] %vm1096_vm2, %v1435_v27  ;;  %1141 = vst.msk [vmem:[%s2127_s17 + $0xb0] sm:$0xf] %vm1096_vm2, %v1467_v28  ;;  %v1436_v35 = vpack.c.bf16 %v636_v33, %v636_v33  ;;  %v1468_v36 = vpack.c.bf16 %v764_v34, %v764_v34 }
 0x15b   : > { %1112 = vst.msk [vmem:[%s2127_s17 + $0x3c] sm:$0xf] %vm1096_vm2, %v1438_v31  ;;  %1144 = vst.msk [vmem:[%s2127_s17 + $0xbc] sm:$0xf] %vm1096_vm2, %v1470_v32 }
 0x15c   : > { %1110 = vst.msk [vmem:[%s2127_s17 + $0x34] sm:$0xf] %vm1096_vm2, %v1436_v35  ;;  %1142 = vst.msk [vmem:[%s2127_s17 + $0xb4] sm:$0xf] %vm1096_vm2, %v1468_v36 }
 0x15e   : > { %v1550_v37 = vpop.f32.mrb[16].mxu0  ;;  %v1582_v38 = vpop.f32.mrb[16].mxu1 }
 0x15f   : > { %v1441_v39 = vpack.c.bf16 %v1550_v37, %v1550_v37  ;;  %v1473_v40 = vpack.c.bf16 %v1582_v38, %v1582_v38  ;;  %v649_v41 = vpop.f32.mrb[17].mxu0  ;;  %v777_v42 = vpop.f32.mrb[17].mxu1 }
 0x160   : > { %v1439_v43 = vpack.c.bf16 %v649_v41, %v649_v41  ;;  %v1471_v44 = vpack.c.bf16 %v777_v42, %v777_v42  ;;  %v1551_v45 = vpop.f32.mrb[18].mxu0  ;;  %v1583_v46 = vpop.f32.mrb[18].mxu1 }
 0x161   : > { %1115 = vst.msk [vmem:[%s2127_s17 + $0x48] sm:$0xf] %vm1096_vm2, %v1441_v39  ;;  %1147 = vst.msk [vmem:[%s2127_s17 + $0xc8] sm:$0xf] %vm1096_vm2, %v1473_v40  ;;  %v1442_v47 = vpack.c.bf16 %v1551_v45, %v1551_v45  ;;  %v1474_v48 = vpack.c.bf16 %v1583_v46, %v1583_v46  ;;  %v652_v49 = vpop.f32.mrb[19].mxu0  ;;  %v780_v50 = vpop.f32.mrb[19].mxu1 }
 0x162   : > { %1113 = vst.msk [vmem:[%s2127_s17 + $0x40] sm:$0xf] %vm1096_vm2, %v1439_v43  ;;  %1145 = vst.msk [vmem:[%s2127_s17 + $0xc0] sm:$0xf] %vm1096_vm2, %v1471_v44  ;;  %v1440_v51 = vpack.c.bf16 %v652_v49, %v652_v49  ;;  %v1472_v52 = vpack.c.bf16 %v780_v50, %v780_v50 }
 0x163   : > { %1116 = vst.msk [vmem:[%s2127_s17 + $0x4c] sm:$0xf] %vm1096_vm2, %v1442_v47  ;;  %1148 = vst.msk [vmem:[%s2127_s17 + $0xcc] sm:$0xf] %vm1096_vm2, %v1474_v48 }
 0x164   : > { %1114 = vst.msk [vmem:[%s2127_s17 + $0x44] sm:$0xf] %vm1096_vm2, %v1440_v51  ;;  %1146 = vst.msk [vmem:[%s2127_s17 + $0xc4] sm:$0xf] %vm1096_vm2, %v1472_v52 }
 0x166   : > { %v1554_v53 = vpop.f32.mrb[20].mxu0  ;;  %v1586_v54 = vpop.f32.mrb[20].mxu1 }
 0x167   : > { %v1445_v55 = vpack.c.bf16 %v1554_v53, %v1554_v53  ;;  %v1477_v56 = vpack.c.bf16 %v1586_v54, %v1586_v54  ;;  %v665_v57 = vpop.f32.mrb[21].mxu0  ;;  %v793_v58 = vpop.f32.mrb[21].mxu1 }
 0x168   : > { %v1443_v59 = vpack.c.bf16 %v665_v57, %v665_v57  ;;  %v1475_v60 = vpack.c.bf16 %v793_v58, %v793_v58  ;;  %v1555_v61 = vpop.f32.mrb[22].mxu0  ;;  %v1587_v62 = vpop.f32.mrb[22].mxu1 }
 0x169   : > { %1119 = vst.msk [vmem:[%s2127_s17 + $0x58] sm:$0xf] %vm1096_vm2, %v1445_v55  ;;  %1151 = vst.msk [vmem:[%s2127_s17 + $0xd8] sm:$0xf] %vm1096_vm2, %v1477_v56  ;;  %v1446_v63 = vpack.c.bf16 %v1555_v61, %v1555_v61  ;;  %v1478_v0 = vpack.c.bf16 %v1587_v62, %v1587_v62  ;;  %v668_v1 = vpop.f32.mrb[23].mxu0  ;;  %v796_v2 = vpop.f32.mrb[23].mxu1 }
 0x16a   : > { %1117 = vst.msk [vmem:[%s2127_s17 + $0x50] sm:$0xf] %vm1096_vm2, %v1443_v59  ;;  %1149 = vst.msk [vmem:[%s2127_s17 + $0xd0] sm:$0xf] %vm1096_vm2, %v1475_v60  ;;  %v1444_v3 = vpack.c.bf16 %v668_v1, %v668_v1  ;;  %v1476_v4 = vpack.c.bf16 %v796_v2, %v796_v2 }
 0x16b   : > { %1120 = vst.msk [vmem:[%s2127_s17 + $0x5c] sm:$0xf] %vm1096_vm2, %v1446_v63  ;;  %1152 = vst.msk [vmem:[%s2127_s17 + $0xdc] sm:$0xf] %vm1096_vm2, %v1478_v0 }
 0x16c   : > { %1118 = vst.msk [vmem:[%s2127_s17 + $0x54] sm:$0xf] %vm1096_vm2, %v1444_v3  ;;  %1150 = vst.msk [vmem:[%s2127_s17 + $0xd4] sm:$0xf] %vm1096_vm2, %v1476_v4 }
 0x16e   : > { %v1558_v5 = vpop.f32.mrb[24].mxu0  ;;  %v1590_v6 = vpop.f32.mrb[24].mxu1 }
 0x16f   : > { %v1449_v7 = vpack.c.bf16 %v1558_v5, %v1558_v5  ;;  %v1481_v8 = vpack.c.bf16 %v1590_v6, %v1590_v6  ;;  %v681_v9 = vpop.f32.mrb[25].mxu0  ;;  %v809_v10 = vpop.f32.mrb[25].mxu1 }
 0x170   : > { %v1447_v11 = vpack.c.bf16 %v681_v9, %v681_v9  ;;  %v1479_v12 = vpack.c.bf16 %v809_v10, %v809_v10  ;;  %v1559_v13 = vpop.f32.mrb[26].mxu0  ;;  %v1591_v14 = vpop.f32.mrb[26].mxu1 }
 0x171   : > { %1123 = vst.msk [vmem:[%s2127_s17 + $0x68] sm:$0xf] %vm1096_vm2, %v1449_v7  ;;  %1155 = vst.msk [vmem:[%s2127_s17 + $0xe8] sm:$0xf] %vm1096_vm2, %v1481_v8  ;;  %v1450_v15 = vpack.c.bf16 %v1559_v13, %v1559_v13  ;;  %v1482_v16 = vpack.c.bf16 %v1591_v14, %v1591_v14  ;;  %v684_v17 = vpop.f32.mrb[27].mxu0  ;;  %v812_v18 = vpop.f32.mrb[27].mxu1 }
 0x172   : > { %1121 = vst.msk [vmem:[%s2127_s17 + $0x60] sm:$0xf] %vm1096_vm2, %v1447_v11  ;;  %1153 = vst.msk [vmem:[%s2127_s17 + $0xe0] sm:$0xf] %vm1096_vm2, %v1479_v12  ;;  %v1448_v19 = vpack.c.bf16 %v684_v17, %v684_v17  ;;  %v1480_v20 = vpack.c.bf16 %v812_v18, %v812_v18 }
 0x173   : > { %1124 = vst.msk [vmem:[%s2127_s17 + $0x6c] sm:$0xf] %vm1096_vm2, %v1450_v15  ;;  %1156 = vst.msk [vmem:[%s2127_s17 + $0xec] sm:$0xf] %vm1096_vm2, %v1482_v16 }
 0x174   : > { %1122 = vst.msk [vmem:[%s2127_s17 + $0x64] sm:$0xf] %vm1096_vm2, %v1448_v19  ;;  %1154 = vst.msk [vmem:[%s2127_s17 + $0xe4] sm:$0xf] %vm1096_vm2, %v1480_v20 }
 0x176   : > { %v1562_v21 = vpop.f32.mrb[28].mxu0  ;;  %v1594_v22 = vpop.f32.mrb[28].mxu1 }
 0x177   : > { %v1453_v23 = vpack.c.bf16 %v1562_v21, %v1562_v21  ;;  %v1485_v24 = vpack.c.bf16 %v1594_v22, %v1594_v22  ;;  %v697_v25 = vpop.f32.mrb[29].mxu0  ;;  %v825_v26 = vpop.f32.mrb[29].mxu1 }
 0x178   : > { %v1451_v27 = vpack.c.bf16 %v697_v25, %v697_v25  ;;  %v1483_v28 = vpack.c.bf16 %v825_v26, %v825_v26  ;;  %v1563_v29 = vpop.f32.mrb[30].mxu0  ;;  %v1595_v30 = vpop.f32.mrb[30].mxu1 }
 0x179   : > { %1127 = vst.msk [vmem:[%s2127_s17 + $0x78] sm:$0xf] %vm1096_vm2, %v1453_v23  ;;  %1159 = vst.msk [vmem:[%s2127_s17 + $0xf8] sm:$0xf] %vm1096_vm2, %v1485_v24  ;;  %v1454_v31 = vpack.c.bf16 %v1563_v29, %v1563_v29  ;;  %v1486_v32 = vpack.c.bf16 %v1595_v30, %v1595_v30  ;;  %v700_v33 = vpop.f32.mrb[31].mxu0  ;;  %v828_v34 = vpop.f32.mrb[31].mxu1 }
 0x17a   : > { %1125 = vst.msk [vmem:[%s2127_s17 + $0x70] sm:$0xf] %vm1096_vm2, %v1451_v27  ;;  %1157 = vst.msk [vmem:[%s2127_s17 + $0xf0] sm:$0xf] %vm1096_vm2, %v1483_v28  ;;  %v1452_v35 = vpack.c.bf16 %v700_v33, %v700_v33  ;;  %v1484_v36 = vpack.c.bf16 %v828_v34, %v828_v34 }
 0x17b   : > { %1128 = vst.msk [vmem:[%s2127_s17 + $0x7c] sm:$0xf] %vm1096_vm2, %v1454_v31  ;;  %1160 = vst.msk [vmem:[%s2127_s17 + $0xfc] sm:$0xf] %vm1096_vm2, %v1486_v32 }
 0x17c   : > { %1126 = vst.msk [vmem:[%s2127_s17 + $0x74] sm:$0xf] %vm1096_vm2, %v1452_v35  ;;  %1158 = vst.msk [vmem:[%s2127_s17 + $0xf4] sm:$0xf] %vm1096_vm2, %v1484_v36 }
 0x17d   : > { %1790 = shalt.err (!%p1787_p5)
}
 0x17e   : > { %s1791_s23 = scalar_lea.hbm %s2250_s7, 4096  ;;  %s1795_s26 = scalar_lea.hbm %s2315_s2, 8192 }
 0x17f   : > { %p1792_p9 = scmp.ne.s32.totalorder %s2250_s7, %s1791_s23  ;;  %p1796_p3 = scmp.lt.u32.totalorder %s2250_s7, %s2315_s2 }
 0x180   : > { %p1797_p7 = scmp.lt.u32.totalorder %s1795_s26, %s1791_s23  ;;  %p1799_p4 = scmp.lt.u32.totalorder %s1791_s23, %s2250_s7 }
 0x181   : > { %p1793_p1 = pnand %p1792_p9, %p1986_p10 }
 0x182   : > { %p1798_p13 = por %p1797_p7, %p1796_p3 }
 0x183   : > { %p1794_p2 = pneg %p1793_p1 }
 0x184   : > { %p1800_p6 = por %p1799_p4, %p1798_p13 }
 0x186   : > { %p1801_p8 = pnand %p1800_p6, %p1794_p2 }
 0x188   : > { %1804 = shalt.err (!%p1801_p8)
}
 0x189   : > { %s1870_s8 = smov 64   ;;  %s1871_s17 = smov 4  }
 0x18a   : > { %1612 = dma.vmem_to_hbm [thread:$0]  (%p1986_p10), %s2252_s21, 4096, %s2250_s7, %s1162_s4, %s1870_s8, %s1870_s8, %s1871_s17  }
 0x18b PF: > { %s1192_s19 = sand.u32 1, %s1843_s9   ;;  %p2333_p12 = scmp.ne.s32.totalorder %s2323_s20, 0 }
 0x18c   : > { %p2334_p11 = scmp.ge.s32.totalorder %s1863_s14, 2  ;;  %s1193_s12 = scalar_lea.sflag [#allocation4], %s1192_s19 }
 0x18e   : > { %p1623_p0 = pnand %p2334_p11, %p2333_p12 }
 0x190   : > { %1838 = dma.done.wait (!%p1623_p0), %s1193_s12, 4096  }
 0x191   : > { %1840 = vsyncadd (!%p1623_p0), %s1193_s12, 4294963200  ;;  %s19_s14 = sadd.s32 1, %s1863_s14   ;;  %s2335_s9 = smov %s1847_s10 }
 0x192   : > { %p16_p5 = scmp.ge.s32.totalorder %s19_s14, 4   ;;  %s2336_s10 = smov %s1851_s11 }
 0x193   : > { %s2337_s11 = smov %s1995_s28  ;;  %s2338_s12 = smov %s1859_s13 }
 0x194   : > { %s2339_s13 = smov %s2341_s25  ;;  %18 = sbr.rel (!%p16_p5) target bundleno = 7 (0x7), region = 78 }
 0x19b   :  { %1198 = vsyncpa [#allocation3], 1 }
 0x19c   :  { %1200 = vsyncpa [#allocation3 + $0x1], 1 }
 0x19d   :  { %1201 = vsyncpa [#allocation6], 1 }
 0x19e   :  { %1202 = vsyncpa [#allocation4], 1 }
 0x19f   :  { %1204 = vsyncpa [#allocation4 + $0x1], 1 }

</bundles_post_ra>
